<compile_context>
chip_gen: v7x
topology: tpu7x:2x2x1
jax: 0.10.0
libtpu: 0.0.40
codegen_flags: <defaults>
</compile_context>

<pallas_src>
import jax
import jax.numpy as jnp
from jax import lax
from jax.experimental import pallas as pl
from jax.experimental.pallas import tpu as pltpu


B_BLK = 8  # f32 sublane count: one full sublane tile of series per grid step.


def _lstm_fc_kernel(x_ref, w_ih_ref, w_hh_ref, b_ref, fc_w_ref, fc_b_ref,
                    out_ref):
    """Fused single-layer LSTM over the full sequence + Linear head.

    x_ref    : (B, T, F)     batch block of the input sequence
    w_ih_ref : (F, 4H)       input->gate weights, gates [i|f|o|g] on last axis,
                             g-columns pre-scaled by 2 (tanh via sigmoid trick)
    w_hh_ref : (H, 4H)       hidden->gate weights (same layout / scaling)
    b_ref    : (1, 4H)       combined bias b_ih + b_hh (same layout / scaling)
    fc_w_ref : (H, O_pad)    Linear weight, zero-padded to 128 output lanes
    fc_b_ref : (1, O_pad)    Linear bias, zero-padded
    out_ref  : (B, O_pad)    fc(h_T), lane-dense store
    """
    B, T, F = x_ref.shape
    H = w_hh_ref.shape[0]
    G = 4 * H

    # ---- Prologue: one fused input-projection matmul (off the serial path). -
    x2d = x_ref[...].reshape(B * T, F)
    xw = jnp.dot(x2d, w_ih_ref[...],
                 preferred_element_type=jnp.float32) + b_ref[...]
    xw = xw.reshape(B, T, G)          # stays in vregs; sliced statically below

    # ---- Recurrence: h/c live in vregs; one fused (B, 4H) matmul per step. --
    w_hh = w_hh_ref[...]
    h = jnp.zeros((B, H), jnp.float32)
    c = jnp.zeros((B, H), jnp.float32)

    # Static Python unroll (T small & static): full cross-step scheduling
    # visibility; xw[:, t, :] is a static slice independent of h, so the
    # sublane extraction overlaps the previous step's matmul.
    for t in range(T):
        gates = xw[:, t, :] + jnp.dot(h, w_hh,
                                      preferred_element_type=jnp.float32)
        sig = jax.nn.sigmoid(gates)          # single full-width EUP pass
        i_g = sig[:, 0 * H:1 * H]
        f_g = sig[:, 1 * H:2 * H]
        o_g = sig[:, 2 * H:3 * H]
        g_g = 2.0 * sig[:, 3 * H:4 * H] - 1.0   # tanh(x) = 2*sigmoid(2x) - 1
        c = f_g * c + i_g * g_g
        h = o_g * jnp.tanh(c)

    # ---- Fully-connected head on the final hidden state (lane-dense). ------
    out_ref[...] = (jnp.dot(h, fc_w_ref[...],
                            preferred_element_type=jnp.float32)
                    + fc_b_ref[...])


def single_step_lstm_forecaster(x, params):
    """x: (batch, seq, n_features) f32 -> (n_lstm_layers=1, batch, n_outputs)."""
    w_ih, w_hh, b, fc_w, fc_b = (params['w_ih'], params['w_hh'], params['b'],
                                 params['fc_w'], params['fc_b'])
    B, T, F = x.shape
    H = w_hh.shape[0]
    O = fc_w.shape[-1]
    G = 4 * H

    # Pre-scale the g-gate (last H) columns by 2 so the kernel recovers
    # tanh(g) = 2*sigmoid(2g) - 1 from the single sigmoid pass.  (In a real
    # deployment this would be done once at parameter-load time.)
    gate_scale = jnp.concatenate(
        [jnp.ones((3 * H,), jnp.float32), jnp.full((H,), 2.0, jnp.float32)])
    w_ih_k = w_ih * gate_scale
    w_hh_k = w_hh * gate_scale
    b_k = b * gate_scale

    # Lane-dense output: pad the fc head to a multiple of 128 output lanes.
    o_pad = ((O + 127) // 128) * 128
    fc_w_p = jnp.zeros((H, o_pad), jnp.float32).at[:, :O].set(fc_w)
    fc_b_p = jnp.zeros((1, o_pad), jnp.float32).at[:, :O].set(fc_b)

    # Fill sublanes: pad batch to a multiple of B_BLK and grid over batch
    # blocks with "parallel" semantics (shards across v7x's 2 TensorCores).
    n_blocks = pl.cdiv(B, B_BLK)
    b_pad = n_blocks * B_BLK
    x_p = jnp.pad(x, ((0, b_pad - B), (0, 0), (0, 0))) if b_pad != B else x

    out = pl.pallas_call(
        _lstm_fc_kernel,
        out_shape=jax.ShapeDtypeStruct((b_pad, o_pad), jnp.float32),
        grid_spec=pltpu.PrefetchScalarGridSpec(
            num_scalar_prefetch=0,
            grid=(n_blocks,),
            in_specs=[
                pl.BlockSpec((B_BLK, T, F), lambda i: (i, 0, 0)),
                pl.BlockSpec((F, G), lambda i: (0, 0)),
                pl.BlockSpec((H, G), lambda i: (0, 0)),
                pl.BlockSpec((1, G), lambda i: (0, 0)),
                pl.BlockSpec((H, o_pad), lambda i: (0, 0)),
                pl.BlockSpec((1, o_pad), lambda i: (0, 0)),
            ],
            out_specs=pl.BlockSpec((B_BLK, o_pad), lambda i: (i, 0)),
        ),
        compiler_params=pltpu.CompilerParams(
            dimension_semantics=("parallel",)),
    )(x_p, w_ih_k, w_hh_k, b_k, fc_w_p, fc_b_p)

    # PyTorch returns fc(h) with h of shape (n_lstm_layers, B, H) -> (1, B, O).
    return out[:B, :O][None, :, :]


def init_params(key, n_features, n_hidden, n_outputs):
    """Parameter init mirroring nn.LSTM / nn.Linear shapes.

    Gate-concatenated layout: W_ih (F, 4H), W_hh (H, 4H), bias (1, 4H) with
    gate order [i, f, o, g] along the last axis (pre-transposed for x @ W),
    canonical (unscaled) values.
    """
    k = 1.0 / jnp.sqrt(jnp.float32(n_hidden))
    keys = jax.random.split(key, 6)
    w_ih = jax.random.uniform(keys[0], (n_features, 4 * n_hidden),
                              minval=-k, maxval=k, dtype=jnp.float32)
    w_hh = jax.random.uniform(keys[1], (n_hidden, 4 * n_hidden),
                              minval=-k, maxval=k, dtype=jnp.float32)
    b_ih = jax.random.uniform(keys[2], (1, 4 * n_hidden),
                              minval=-k, maxval=k, dtype=jnp.float32)
    b_hh = jax.random.uniform(keys[3], (1, 4 * n_hidden),
                              minval=-k, maxval=k, dtype=jnp.float32)
    fc_w = jax.random.uniform(keys[4], (n_hidden, n_outputs),
                              minval=-k, maxval=k, dtype=jnp.float32)
    fc_b = jax.random.uniform(keys[5], (1, n_outputs),
                              minval=-k, maxval=k, dtype=jnp.float32)
    return dict(w_ih=w_ih, w_hh=w_hh, b=b_ih + b_hh, fc_w=fc_w, fc_b=fc_b)


def reference_forward(x, params):
    """Pure-JAX reference of the PyTorch forward (canonical LSTM math)."""
    w_ih, w_hh, b, fc_w, fc_b = (params['w_ih'], params['w_hh'], params['b'],
                                 params['fc_w'], params['fc_b'])
    B = x.shape[0]
    H = w_hh.shape[0]
    h = jnp.zeros((B, H), jnp.float32)
    c = jnp.zeros((B, H), jnp.float32)

    def step(carry, x_t):
        h, c = carry
        gates = x_t @ w_ih + h @ w_hh + b            # (B, 4H), [i|f|o|g]
        i_g = jax.nn.sigmoid(gates[:, 0 * H:1 * H])
        f_g = jax.nn.sigmoid(gates[:, 1 * H:2 * H])
        o_g = jax.nn.sigmoid(gates[:, 2 * H:3 * H])
        g_g = jnp.tanh(gates[:, 3 * H:4 * H])
        c_new = f_g * c + i_g * g_g
        h_new = o_g * jnp.tanh(c_new)
        return (h_new, c_new), None

    (h, c), _ = lax.scan(step, (h, c), jnp.transpose(x, (1, 0, 2)))
    return (h @ fc_w + fc_b)[None, :, :]


if __name__ == "__main__":
    batch, seq, n_features, n_hidden, n_outputs = 8, 8, 4, 32, 4

    key = jax.random.PRNGKey(0)
    key_x, key_p = jax.random.split(key)
    x = jax.random.normal(key_x, (batch, seq, n_features), dtype=jnp.float32)
    params = init_params(key_p, n_features, n_hidden, n_outputs)

    out = jax.block_until_ready(single_step_lstm_forecaster(x, params))
    ref = jax.block_until_ready(reference_forward(x, params))

    assert out.shape == (1, batch, n_outputs), out.shape
    assert jnp.allclose(out, ref, atol=1e-4, rtol=1e-4), (
        f"max abs err {jnp.max(jnp.abs(out - ref))}")
    print("KERNEL_OK")
</pallas_src>

<mosaic_0001>
module attributes {stable_mosaic.version = 11 : i64} {
  func.func @_lstm_fc_kernel(%arg0: i32, %arg1: memref<8x8x4xf32, #tpu.memory_space<vmem>>, %arg2: memref<4x128xf32, #tpu.memory_space<vmem>>, %arg3: memref<32x128xf32, #tpu.memory_space<vmem>>, %arg4: memref<1x128xf32, #tpu.memory_space<vmem>>, %arg5: memref<32x128xf32, #tpu.memory_space<vmem>>, %arg6: memref<1x128xf32, #tpu.memory_space<vmem>>, %arg7: memref<8x128xf32, #tpu.memory_space<vmem>>) attributes {dimension_semantics = [#tpu.dimension_semantics<parallel>], iteration_bounds = array<i64: 1>, scalar_prefetch = 0 : i64, scratch_operands = 0 : i64, tpu.core_type = #tpu.core_type<tc>, window_params = [{transform_indices = @transform_0, window_bounds = array<i64: 8, 8, 4>}, {pipeline_mode = #tpu.pipeline_mode<synchronous>, transform_indices = @transform_1, window_bounds = array<i64: 4, 128>}, {pipeline_mode = #tpu.pipeline_mode<synchronous>, transform_indices = @transform_2, window_bounds = array<i64: 32, 128>}, {pipeline_mode = #tpu.pipeline_mode<synchronous>, transform_indices = @transform_3, window_bounds = array<i64: 1, 128>}, {pipeline_mode = #tpu.pipeline_mode<synchronous>, transform_indices = @transform_4, window_bounds = array<i64: 32, 128>}, {pipeline_mode = #tpu.pipeline_mode<synchronous>, transform_indices = @transform_5, window_bounds = array<i64: 1, 128>}, {transform_indices = @transform_6, window_bounds = array<i64: 8, 128>}]} {
    %c0 = arith.constant 0 : index
    %c0_0 = arith.constant 0 : index
    %c0_1 = arith.constant 0 : index
    %0 = vector.load %arg1[%c0, %c0_0, %c0_1] : memref<8x8x4xf32, #tpu.memory_space<vmem>>, vector<8x8x4xf32>
    %1 = vector.shape_cast %0 : vector<8x8x4xf32> to vector<64x4xf32>
    %c0_2 = arith.constant 0 : index
    %c0_3 = arith.constant 0 : index
    %2 = vector.load %arg2[%c0_2, %c0_3] : memref<4x128xf32, #tpu.memory_space<vmem>>, vector<4x128xf32>
    %cst = arith.constant dense<0.000000e+00> : vector<64x128xf32>
    %3 = tpu.matmul %1, %2, %cst {dimension_numbers = #tpu.dot_dimension_numbers<[1], [0], [0], [1], [0, 0, 1, 1], [], []>} : vector<64x4xf32>, vector<4x128xf32>, vector<64x128xf32> -> vector<64x128xf32>
    %c0_4 = arith.constant 0 : index
    %c0_5 = arith.constant 0 : index
    %4 = vector.load %arg4[%c0_4, %c0_5] : memref<1x128xf32, #tpu.memory_space<vmem>>, vector<1x128xf32>
    %5 = vector.broadcast %4 : vector<1x128xf32> to vector<64x128xf32>
    %6 = arith.addf %3, %5 : vector<64x128xf32>
    %7 = vector.shape_cast %6 : vector<64x128xf32> to vector<8x8x128xf32>
    %c0_6 = arith.constant 0 : index
    %c0_7 = arith.constant 0 : index
    %8 = vector.load %arg3[%c0_6, %c0_7] : memref<32x128xf32, #tpu.memory_space<vmem>>, vector<32x128xf32>
    %cst_8 = arith.constant 0.000000e+00 : f32
    %9 = vector.broadcast %cst_8 : f32 to vector<8x32xf32>
    %cst_9 = arith.constant 0.000000e+00 : f32
    %10 = vector.broadcast %cst_9 : f32 to vector<8x32xf32>
    %11 = vector.extract_strided_slice %7 {offsets = [0, 0, 0], sizes = [8, 1, 128], strides = [1, 1, 1]} : vector<8x8x128xf32> to vector<8x1x128xf32>
    %12 = vector.shape_cast %11 : vector<8x1x128xf32> to vector<8x128xf32>
    %cst_10 = arith.constant dense<0.000000e+00> : vector<8x128xf32>
    %13 = tpu.matmul %9, %8, %cst_10 {dimension_numbers = #tpu.dot_dimension_numbers<[1], [0], [0], [1], [0, 0, 1, 1], [], []>} : vector<8x32xf32>, vector<32x128xf32>, vector<8x128xf32> -> vector<8x128xf32>
    %14 = arith.addf %12, %13 : vector<8x128xf32>
    %15 = arith.negf %14 : vector<8x128xf32>
    %16 = math.exp %15 : vector<8x128xf32>
    %cst_11 = arith.constant 1.000000e+00 : f32
    %17 = vector.broadcast %cst_11 : f32 to vector<8x128xf32>
    %18 = arith.addf %17, %16 : vector<8x128xf32>
    %19 = arith.divf %17, %18 : vector<8x128xf32>
    %20 = vector.extract_strided_slice %19 {offsets = [0, 0], sizes = [8, 32], strides = [1, 1]} : vector<8x128xf32> to vector<8x32xf32>
    %21 = vector.extract_strided_slice %19 {offsets = [0, 32], sizes = [8, 32], strides = [1, 1]} : vector<8x128xf32> to vector<8x32xf32>
    %22 = vector.extract_strided_slice %19 {offsets = [0, 64], sizes = [8, 32], strides = [1, 1]} : vector<8x128xf32> to vector<8x32xf32>
    %23 = vector.extract_strided_slice %19 {offsets = [0, 96], sizes = [8, 32], strides = [1, 1]} : vector<8x128xf32> to vector<8x32xf32>
    %cst_12 = arith.constant 2.000000e+00 : f32
    %24 = vector.broadcast %cst_12 : f32 to vector<8x32xf32>
    %25 = arith.mulf %24, %23 : vector<8x32xf32>
    %cst_13 = arith.constant 1.000000e+00 : f32
    %26 = vector.broadcast %cst_13 : f32 to vector<8x32xf32>
    %27 = arith.subf %25, %26 : vector<8x32xf32>
    %28 = arith.mulf %21, %10 : vector<8x32xf32>
    %29 = arith.mulf %20, %27 : vector<8x32xf32>
    %30 = arith.addf %28, %29 : vector<8x32xf32>
    %31 = math.tanh %30 : vector<8x32xf32>
    %32 = arith.mulf %22, %31 : vector<8x32xf32>
    %33 = vector.extract_strided_slice %7 {offsets = [0, 1, 0], sizes = [8, 1, 128], strides = [1, 1, 1]} : vector<8x8x128xf32> to vector<8x1x128xf32>
    %34 = vector.shape_cast %33 : vector<8x1x128xf32> to vector<8x128xf32>
    %cst_14 = arith.constant dense<0.000000e+00> : vector<8x128xf32>
    %35 = tpu.matmul %32, %8, %cst_14 {dimension_numbers = #tpu.dot_dimension_numbers<[1], [0], [0], [1], [0, 0, 1, 1], [], []>} : vector<8x32xf32>, vector<32x128xf32>, vector<8x128xf32> -> vector<8x128xf32>
    %36 = arith.addf %34, %35 : vector<8x128xf32>
    %37 = arith.negf %36 : vector<8x128xf32>
    %38 = math.exp %37 : vector<8x128xf32>
    %cst_15 = arith.constant 1.000000e+00 : f32
    %39 = vector.broadcast %cst_15 : f32 to vector<8x128xf32>
    %40 = arith.addf %39, %38 : vector<8x128xf32>
    %41 = arith.divf %39, %40 : vector<8x128xf32>
    %42 = vector.extract_strided_slice %41 {offsets = [0, 0], sizes = [8, 32], strides = [1, 1]} : vector<8x128xf32> to vector<8x32xf32>
    %43 = vector.extract_strided_slice %41 {offsets = [0, 32], sizes = [8, 32], strides = [1, 1]} : vector<8x128xf32> to vector<8x32xf32>
    %44 = vector.extract_strided_slice %41 {offsets = [0, 64], sizes = [8, 32], strides = [1, 1]} : vector<8x128xf32> to vector<8x32xf32>
    %45 = vector.extract_strided_slice %41 {offsets = [0, 96], sizes = [8, 32], strides = [1, 1]} : vector<8x128xf32> to vector<8x32xf32>
    %cst_16 = arith.constant 2.000000e+00 : f32
    %46 = vector.broadcast %cst_16 : f32 to vector<8x32xf32>
    %47 = arith.mulf %46, %45 : vector<8x32xf32>
    %cst_17 = arith.constant 1.000000e+00 : f32
    %48 = vector.broadcast %cst_17 : f32 to vector<8x32xf32>
    %49 = arith.subf %47, %48 : vector<8x32xf32>
    %50 = arith.mulf %43, %30 : vector<8x32xf32>
    %51 = arith.mulf %42, %49 : vector<8x32xf32>
    %52 = arith.addf %50, %51 : vector<8x32xf32>
    %53 = math.tanh %52 : vector<8x32xf32>
    %54 = arith.mulf %44, %53 : vector<8x32xf32>
    %55 = vector.extract_strided_slice %7 {offsets = [0, 2, 0], sizes = [8, 1, 128], strides = [1, 1, 1]} : vector<8x8x128xf32> to vector<8x1x128xf32>
    %56 = vector.shape_cast %55 : vector<8x1x128xf32> to vector<8x128xf32>
    %cst_18 = arith.constant dense<0.000000e+00> : vector<8x128xf32>
    %57 = tpu.matmul %54, %8, %cst_18 {dimension_numbers = #tpu.dot_dimension_numbers<[1], [0], [0], [1], [0, 0, 1, 1], [], []>} : vector<8x32xf32>, vector<32x128xf32>, vector<8x128xf32> -> vector<8x128xf32>
    %58 = arith.addf %56, %57 : vector<8x128xf32>
    %59 = arith.negf %58 : vector<8x128xf32>
    %60 = math.exp %59 : vector<8x128xf32>
    %cst_19 = arith.constant 1.000000e+00 : f32
    %61 = vector.broadcast %cst_19 : f32 to vector<8x128xf32>
    %62 = arith.addf %61, %60 : vector<8x128xf32>
    %63 = arith.divf %61, %62 : vector<8x128xf32>
    %64 = vector.extract_strided_slice %63 {offsets = [0, 0], sizes = [8, 32], strides = [1, 1]} : vector<8x128xf32> to vector<8x32xf32>
    %65 = vector.extract_strided_slice %63 {offsets = [0, 32], sizes = [8, 32], strides = [1, 1]} : vector<8x128xf32> to vector<8x32xf32>
    %66 = vector.extract_strided_slice %63 {offsets = [0, 64], sizes = [8, 32], strides = [1, 1]} : vector<8x128xf32> to vector<8x32xf32>
    %67 = vector.extract_strided_slice %63 {offsets = [0, 96], sizes = [8, 32], strides = [1, 1]} : vector<8x128xf32> to vector<8x32xf32>
    %cst_20 = arith.constant 2.000000e+00 : f32
    %68 = vector.broadcast %cst_20 : f32 to vector<8x32xf32>
    %69 = arith.mulf %68, %67 : vector<8x32xf32>
    %cst_21 = arith.constant 1.000000e+00 : f32
    %70 = vector.broadcast %cst_21 : f32 to vector<8x32xf32>
    %71 = arith.subf %69, %70 : vector<8x32xf32>
    %72 = arith.mulf %65, %52 : vector<8x32xf32>
    %73 = arith.mulf %64, %71 : vector<8x32xf32>
    %74 = arith.addf %72, %73 : vector<8x32xf32>
    %75 = math.tanh %74 : vector<8x32xf32>
    %76 = arith.mulf %66, %75 : vector<8x32xf32>
    %77 = vector.extract_strided_slice %7 {offsets = [0, 3, 0], sizes = [8, 1, 128], strides = [1, 1, 1]} : vector<8x8x128xf32> to vector<8x1x128xf32>
    %78 = vector.shape_cast %77 : vector<8x1x128xf32> to vector<8x128xf32>
    %cst_22 = arith.constant dense<0.000000e+00> : vector<8x128xf32>
    %79 = tpu.matmul %76, %8, %cst_22 {dimension_numbers = #tpu.dot_dimension_numbers<[1], [0], [0], [1], [0, 0, 1, 1], [], []>} : vector<8x32xf32>, vector<32x128xf32>, vector<8x128xf32> -> vector<8x128xf32>
    %80 = arith.addf %78, %79 : vector<8x128xf32>
    %81 = arith.negf %80 : vector<8x128xf32>
    %82 = math.exp %81 : vector<8x128xf32>
    %cst_23 = arith.constant 1.000000e+00 : f32
    %83 = vector.broadcast %cst_23 : f32 to vector<8x128xf32>
    %84 = arith.addf %83, %82 : vector<8x128xf32>
    %85 = arith.divf %83, %84 : vector<8x128xf32>
    %86 = vector.extract_strided_slice %85 {offsets = [0, 0], sizes = [8, 32], strides = [1, 1]} : vector<8x128xf32> to vector<8x32xf32>
    %87 = vector.extract_strided_slice %85 {offsets = [0, 32], sizes = [8, 32], strides = [1, 1]} : vector<8x128xf32> to vector<8x32xf32>
    %88 = vector.extract_strided_slice %85 {offsets = [0, 64], sizes = [8, 32], strides = [1, 1]} : vector<8x128xf32> to vector<8x32xf32>
    %89 = vector.extract_strided_slice %85 {offsets = [0, 96], sizes = [8, 32], strides = [1, 1]} : vector<8x128xf32> to vector<8x32xf32>
    %cst_24 = arith.constant 2.000000e+00 : f32
    %90 = vector.broadcast %cst_24 : f32 to vector<8x32xf32>
    %91 = arith.mulf %90, %89 : vector<8x32xf32>
    %cst_25 = arith.constant 1.000000e+00 : f32
    %92 = vector.broadcast %cst_25 : f32 to vector<8x32xf32>
    %93 = arith.subf %91, %92 : vector<8x32xf32>
    %94 = arith.mulf %87, %74 : vector<8x32xf32>
    %95 = arith.mulf %86, %93 : vector<8x32xf32>
    %96 = arith.addf %94, %95 : vector<8x32xf32>
    %97 = math.tanh %96 : vector<8x32xf32>
    %98 = arith.mulf %88, %97 : vector<8x32xf32>
    %99 = vector.extract_strided_slice %7 {offsets = [0, 4, 0], sizes = [8, 1, 128], strides = [1, 1, 1]} : vector<8x8x128xf32> to vector<8x1x128xf32>
    %100 = vector.shape_cast %99 : vector<8x1x128xf32> to vector<8x128xf32>
    %cst_26 = arith.constant dense<0.000000e+00> : vector<8x128xf32>
    %101 = tpu.matmul %98, %8, %cst_26 {dimension_numbers = #tpu.dot_dimension_numbers<[1], [0], [0], [1], [0, 0, 1, 1], [], []>} : vector<8x32xf32>, vector<32x128xf32>, vector<8x128xf32> -> vector<8x128xf32>
    %102 = arith.addf %100, %101 : vector<8x128xf32>
    %103 = arith.negf %102 : vector<8x128xf32>
    %104 = math.exp %103 : vector<8x128xf32>
    %cst_27 = arith.constant 1.000000e+00 : f32
    %105 = vector.broadcast %cst_27 : f32 to vector<8x128xf32>
    %106 = arith.addf %105, %104 : vector<8x128xf32>
    %107 = arith.divf %105, %106 : vector<8x128xf32>
    %108 = vector.extract_strided_slice %107 {offsets = [0, 0], sizes = [8, 32], strides = [1, 1]} : vector<8x128xf32> to vector<8x32xf32>
    %109 = vector.extract_strided_slice %107 {offsets = [0, 32], sizes = [8, 32], strides = [1, 1]} : vector<8x128xf32> to vector<8x32xf32>
    %110 = vector.extract_strided_slice %107 {offsets = [0, 64], sizes = [8, 32], strides = [1, 1]} : vector<8x128xf32> to vector<8x32xf32>
    %111 = vector.extract_strided_slice %107 {offsets = [0, 96], sizes = [8, 32], strides = [1, 1]} : vector<8x128xf32> to vector<8x32xf32>
    %cst_28 = arith.constant 2.000000e+00 : f32
    %112 = vector.broadcast %cst_28 : f32 to vector<8x32xf32>
    %113 = arith.mulf %112, %111 : vector<8x32xf32>
    %cst_29 = arith.constant 1.000000e+00 : f32
    %114 = vector.broadcast %cst_29 : f32 to vector<8x32xf32>
    %115 = arith.subf %113, %114 : vector<8x32xf32>
    %116 = arith.mulf %109, %96 : vector<8x32xf32>
    %117 = arith.mulf %108, %115 : vector<8x32xf32>
    %118 = arith.addf %116, %117 : vector<8x32xf32>
    %119 = math.tanh %118 : vector<8x32xf32>
    %120 = arith.mulf %110, %119 : vector<8x32xf32>
    %121 = vector.extract_strided_slice %7 {offsets = [0, 5, 0], sizes = [8, 1, 128], strides = [1, 1, 1]} : vector<8x8x128xf32> to vector<8x1x128xf32>
    %122 = vector.shape_cast %121 : vector<8x1x128xf32> to vector<8x128xf32>
    %cst_30 = arith.constant dense<0.000000e+00> : vector<8x128xf32>
    %123 = tpu.matmul %120, %8, %cst_30 {dimension_numbers = #tpu.dot_dimension_numbers<[1], [0], [0], [1], [0, 0, 1, 1], [], []>} : vector<8x32xf32>, vector<32x128xf32>, vector<8x128xf32> -> vector<8x128xf32>
    %124 = arith.addf %122, %123 : vector<8x128xf32>
    %125 = arith.negf %124 : vector<8x128xf32>
    %126 = math.exp %125 : vector<8x128xf32>
    %cst_31 = arith.constant 1.000000e+00 : f32
    %127 = vector.broadcast %cst_31 : f32 to vector<8x128xf32>
    %128 = arith.addf %127, %126 : vector<8x128xf32>
    %129 = arith.divf %127, %128 : vector<8x128xf32>
    %130 = vector.extract_strided_slice %129 {offsets = [0, 0], sizes = [8, 32], strides = [1, 1]} : vector<8x128xf32> to vector<8x32xf32>
    %131 = vector.extract_strided_slice %129 {offsets = [0, 32], sizes = [8, 32], strides = [1, 1]} : vector<8x128xf32> to vector<8x32xf32>
    %132 = vector.extract_strided_slice %129 {offsets = [0, 64], sizes = [8, 32], strides = [1, 1]} : vector<8x128xf32> to vector<8x32xf32>
    %133 = vector.extract_strided_slice %129 {offsets = [0, 96], sizes = [8, 32], strides = [1, 1]} : vector<8x128xf32> to vector<8x32xf32>
    %cst_32 = arith.constant 2.000000e+00 : f32
    %134 = vector.broadcast %cst_32 : f32 to vector<8x32xf32>
    %135 = arith.mulf %134, %133 : vector<8x32xf32>
    %cst_33 = arith.constant 1.000000e+00 : f32
    %136 = vector.broadcast %cst_33 : f32 to vector<8x32xf32>
    %137 = arith.subf %135, %136 : vector<8x32xf32>
    %138 = arith.mulf %131, %118 : vector<8x32xf32>
    %139 = arith.mulf %130, %137 : vector<8x32xf32>
    %140 = arith.addf %138, %139 : vector<8x32xf32>
    %141 = math.tanh %140 : vector<8x32xf32>
    %142 = arith.mulf %132, %141 : vector<8x32xf32>
    %143 = vector.extract_strided_slice %7 {offsets = [0, 6, 0], sizes = [8, 1, 128], strides = [1, 1, 1]} : vector<8x8x128xf32> to vector<8x1x128xf32>
    %144 = vector.shape_cast %143 : vector<8x1x128xf32> to vector<8x128xf32>
    %cst_34 = arith.constant dense<0.000000e+00> : vector<8x128xf32>
    %145 = tpu.matmul %142, %8, %cst_34 {dimension_numbers = #tpu.dot_dimension_numbers<[1], [0], [0], [1], [0, 0, 1, 1], [], []>} : vector<8x32xf32>, vector<32x128xf32>, vector<8x128xf32> -> vector<8x128xf32>
    %146 = arith.addf %144, %145 : vector<8x128xf32>
    %147 = arith.negf %146 : vector<8x128xf32>
    %148 = math.exp %147 : vector<8x128xf32>
    %cst_35 = arith.constant 1.000000e+00 : f32
    %149 = vector.broadcast %cst_35 : f32 to vector<8x128xf32>
    %150 = arith.addf %149, %148 : vector<8x128xf32>
    %151 = arith.divf %149, %150 : vector<8x128xf32>
    %152 = vector.extract_strided_slice %151 {offsets = [0, 0], sizes = [8, 32], strides = [1, 1]} : vector<8x128xf32> to vector<8x32xf32>
    %153 = vector.extract_strided_slice %151 {offsets = [0, 32], sizes = [8, 32], strides = [1, 1]} : vector<8x128xf32> to vector<8x32xf32>
    %154 = vector.extract_strided_slice %151 {offsets = [0, 64], sizes = [8, 32], strides = [1, 1]} : vector<8x128xf32> to vector<8x32xf32>
    %155 = vector.extract_strided_slice %151 {offsets = [0, 96], sizes = [8, 32], strides = [1, 1]} : vector<8x128xf32> to vector<8x32xf32>
    %cst_36 = arith.constant 2.000000e+00 : f32
    %156 = vector.broadcast %cst_36 : f32 to vector<8x32xf32>
    %157 = arith.mulf %156, %155 : vector<8x32xf32>
    %cst_37 = arith.constant 1.000000e+00 : f32
    %158 = vector.broadcast %cst_37 : f32 to vector<8x32xf32>
    %159 = arith.subf %157, %158 : vector<8x32xf32>
    %160 = arith.mulf %153, %140 : vector<8x32xf32>
    %161 = arith.mulf %152, %159 : vector<8x32xf32>
    %162 = arith.addf %160, %161 : vector<8x32xf32>
    %163 = math.tanh %162 : vector<8x32xf32>
    %164 = arith.mulf %154, %163 : vector<8x32xf32>
    %165 = vector.extract_strided_slice %7 {offsets = [0, 7, 0], sizes = [8, 1, 128], strides = [1, 1, 1]} : vector<8x8x128xf32> to vector<8x1x128xf32>
    %166 = vector.shape_cast %165 : vector<8x1x128xf32> to vector<8x128xf32>
    %cst_38 = arith.constant dense<0.000000e+00> : vector<8x128xf32>
    %167 = tpu.matmul %164, %8, %cst_38 {dimension_numbers = #tpu.dot_dimension_numbers<[1], [0], [0], [1], [0, 0, 1, 1], [], []>} : vector<8x32xf32>, vector<32x128xf32>, vector<8x128xf32> -> vector<8x128xf32>
    %168 = arith.addf %166, %167 : vector<8x128xf32>
    %169 = arith.negf %168 : vector<8x128xf32>
    %170 = math.exp %169 : vector<8x128xf32>
    %cst_39 = arith.constant 1.000000e+00 : f32
    %171 = vector.broadcast %cst_39 : f32 to vector<8x128xf32>
    %172 = arith.addf %171, %170 : vector<8x128xf32>
    %173 = arith.divf %171, %172 : vector<8x128xf32>
    %174 = vector.extract_strided_slice %173 {offsets = [0, 0], sizes = [8, 32], strides = [1, 1]} : vector<8x128xf32> to vector<8x32xf32>
    %175 = vector.extract_strided_slice %173 {offsets = [0, 32], sizes = [8, 32], strides = [1, 1]} : vector<8x128xf32> to vector<8x32xf32>
    %176 = vector.extract_strided_slice %173 {offsets = [0, 64], sizes = [8, 32], strides = [1, 1]} : vector<8x128xf32> to vector<8x32xf32>
    %177 = vector.extract_strided_slice %173 {offsets = [0, 96], sizes = [8, 32], strides = [1, 1]} : vector<8x128xf32> to vector<8x32xf32>
    %cst_40 = arith.constant 2.000000e+00 : f32
    %178 = vector.broadcast %cst_40 : f32 to vector<8x32xf32>
    %179 = arith.mulf %178, %177 : vector<8x32xf32>
    %cst_41 = arith.constant 1.000000e+00 : f32
    %180 = vector.broadcast %cst_41 : f32 to vector<8x32xf32>
    %181 = arith.subf %179, %180 : vector<8x32xf32>
    %182 = arith.mulf %175, %162 : vector<8x32xf32>
    %183 = arith.mulf %174, %181 : vector<8x32xf32>
    %184 = arith.addf %182, %183 : vector<8x32xf32>
    %185 = math.tanh %184 : vector<8x32xf32>
    %186 = arith.mulf %176, %185 : vector<8x32xf32>
    %c0_42 = arith.constant 0 : index
    %c0_43 = arith.constant 0 : index
    %187 = vector.load %arg5[%c0_42, %c0_43] : memref<32x128xf32, #tpu.memory_space<vmem>>, vector<32x128xf32>
    %cst_44 = arith.constant dense<0.000000e+00> : vector<8x128xf32>
    %188 = tpu.matmul %186, %187, %cst_44 {dimension_numbers = #tpu.dot_dimension_numbers<[1], [0], [0], [1], [0, 0, 1, 1], [], []>} : vector<8x32xf32>, vector<32x128xf32>, vector<8x128xf32> -> vector<8x128xf32>
    %c0_45 = arith.constant 0 : index
    %c0_46 = arith.constant 0 : index
    %189 = vector.load %arg6[%c0_45, %c0_46] : memref<1x128xf32, #tpu.memory_space<vmem>>, vector<1x128xf32>
    %190 = vector.broadcast %189 : vector<1x128xf32> to vector<8x128xf32>
    %191 = arith.addf %188, %190 : vector<8x128xf32>
    %c0_47 = arith.constant 0 : index
    %c0_48 = arith.constant 0 : index
    %192 = vector.load %arg7[%c0_47, %c0_48] : memref<8x128xf32, #tpu.memory_space<vmem>>, vector<8x128xf32>
    tpu.vector_store %arg7[%c0_47, %c0_48], %191 {strides = array<i32>} : memref<8x128xf32, #tpu.memory_space<vmem>>, vector<8x128xf32>,
    return
  }
  func.func @transform_0(%arg0: i32) -> (i32, i32, i32) {
    %c0_i32 = arith.constant 0 : i32
    %c0_i32_0 = arith.constant 0 : i32
    %c0_i32_1 = arith.constant 0 : i32
    return %arg0, %c0_i32, %c0_i32_0 : i32, i32, i32
  }
  func.func @transform_1(%arg0: i32) -> (i32, i32) {
    %c0_i32 = arith.constant 0 : i32
    %c0_i32_0 = arith.constant 0 : i32
    %c0_i32_1 = arith.constant 0 : i32
    return %c0_i32, %c0_i32_0 : i32, i32
  }
  func.func @transform_2(%arg0: i32) -> (i32, i32) {
    %c0_i32 = arith.constant 0 : i32
    %c0_i32_0 = arith.constant 0 : i32
    %c0_i32_1 = arith.constant 0 : i32
    return %c0_i32, %c0_i32_0 : i32, i32
  }
  func.func @transform_3(%arg0: i32) -> (i32, i32) {
    %c0_i32 = arith.constant 0 : i32
    %c0_i32_0 = arith.constant 0 : i32
    %c0_i32_1 = arith.constant 0 : i32
    return %c0_i32, %c0_i32_0 : i32, i32
  }
  func.func @transform_4(%arg0: i32) -> (i32, i32) {
    %c0_i32 = arith.constant 0 : i32
    %c0_i32_0 = arith.constant 0 : i32
    %c0_i32_1 = arith.constant 0 : i32
    return %c0_i32, %c0_i32_0 : i32, i32
  }
  func.func @transform_5(%arg0: i32) -> (i32, i32) {
    %c0_i32 = arith.constant 0 : i32
    %c0_i32_0 = arith.constant 0 : i32
    %c0_i32_1 = arith.constant 0 : i32
    return %c0_i32, %c0_i32_0 : i32, i32
  }
  func.func @transform_6(%arg0: i32) -> (i32, i32) {
    %c0_i32 = arith.constant 0 : i32
    %c0_i32_0 = arith.constant 0 : i32
    return %arg0, %c0_i32 : i32, i32
  }
}

</mosaic_0001>

<bundles_post_ra>
// kernel: tpu_custom_call.1
= control target key start
LH: loop header
LB: loop body
LE: loop exit
PB: predicated region body
PF: predicated region fallthrough
CT: control target
= control target key end

     0   :  { %vm65_vm0 = vcmask 1043456   ;;  %vm40_vm1 = vcmask 31744   ;;  %v3795_v5 = vmov 0.0|0.0   ;;  %vm3796_vm2 = vmmov 0   ;;  %s4922_s0 = inlined_call_operand.vmem [shape: f32[8,8,4], index: 0, kind: input, shape index: {}]   ;;  %s4923_s1 = inlined_call_operand.vmem [shape: f32[4,128], index: 1, kind: input, shape index: {}]   ;;  %s4924_s2 = inlined_call_operand.vmem [shape: f32[32,128], index: 2, kind: input, shape index: {}]   ;;  %s4925_s3 = inlined_call_operand.vmem [shape: f32[1,128], index: 3, kind: input, shape index: {}]   ;;  %s4926_s4 = inlined_call_operand.vmem [shape: f32[32,128], index: 4, kind: input, shape index: {}]   ;;  %s4927_s5 = inlined_call_operand.vmem [shape: f32[1,128], index: 5, kind: input, shape index: {}]   ;;  %s4928_s6 = inlined_call_operand.hbm [shape: f32[8,128], index: 6, kind: output, shape index: {}]  }
   0x1   :  { %v32_v0 = vld [vmem:[%s4923_s1] sm:$0xf]  ;;  %v25_v2 = vld [vmem:[%s4922_s0 + $0x8] sm:$0xff]  ;;  %3327 = vmatprep.subr.bf16.mxu1 %v3795_v5  ;;  %v26_v7 = vld [vmem:[%s4922_s0 + $0x10] sm:$0xff]  ;;  %v3797_v10 = vmov 0.0  }
   0x2   :  { %v24_v1 = vld [vmem:[%s4922_s0] sm:$0xff]  ;;  %3214 = vmatprep.subr.msk.mxu0 %vm65_vm0, %v32_v0  ;;  %v175_v4 = vld [vmem:[%s4924_s2 + $0x8] sm:$0xff]  ;;  %v176_v8 = vld [vmem:[%s4924_s2 + $0x10] sm:$0xff]  ;;  %3236 = vmatprep.mubr.msk.f32.mxu1 %vm3796_vm2, %v3797_v10 }
   0x3   :  { %3216 = vmatprep.mubr.msk.f32.mxu0 %vm40_vm1, %v24_v1  ;;  %v174_v3 = vld [vmem:[%s4924_s2] sm:$0xff]  ;;  %3215 = vmatpush3.msk.msra.mxu0 %vm65_vm0, %v32_v0  ;;  %v177_v9 = vld [vmem:[%s4924_s2 + $0x18] sm:$0xff] }
   0x4   :  { %v3853_v6 = vpack.c.bf16 %v175_v4, %v174_v3  ;;  %3217 = vmatmul.mubr.msk.f32.vlgmr.msra.gmra.mrb[0].mxu0 %vm40_vm1, %v25_v2  ;;  %v27_v11 = vld [vmem:[%s4922_s0 + $0x18] sm:$0xff]  ;;  %v3872_v12 = vpack.c.bf16 %v177_v9, %v176_v8 }
   0x5   :  { %3219 = vmatprep.mubr.msk.f32.mxu0 %vm40_vm1, %v26_v7 }
   0x6   :  { %3329 = vmatpush3.bf16.msra.mxu1 %v3853_v6 }
   0x7   :  { %11 = vsyncpa [#allocation3], 0  ;;  %3330 = vmatprep.subr.bf16.mxu1 %v3795_v5  ;;  %v28_v13 = vld [vmem:[%s4922_s0 + $0x20] sm:$0xff]  ;;  %3339 = vmatprep.subr.bf16.mxu0 %v3795_v5  ;;  %v29_v14 = vld [vmem:[%s4922_s0 + $0x28] sm:$0xff]  ;;  %vm485_vm3 = vcmask 1041409   ;;  %vm488_vm4 = vcmask 1042434  }
   0x8   :  { %3341 = vmatpush3.bf16.msra.mxu0 %v3853_v6  ;;  %v30_v15 = vld [vmem:[%s4922_s0 + $0x30] sm:$0xff]  ;;  %v31_v16 = vld [vmem:[%s4922_s0 + $0x38] sm:$0xff]  ;;  %v3013_v19 = vld [vmem:[%s4925_s3] ss:$0 sm:$0xff]  ;;  %s3798_s3 = smov 32   ;;  %vm491_vm5 = vcmask 1043459  }
   0x9   :  { %3220 = vmatmul.mubr.msk.f32.gmra.mrb[2].mxu0 %vm40_vm1, %v27_v11  ;;  %3342 = vmatprep.subr.bf16.mxu0 %v3795_v5  ;;  %vm494_vm6 = vcmask 1044484   ;;  %vm497_vm7 = vcmask 1045509   ;;  %vm500_vm8 = vcmask 1046534   ;;  %vm503_vm9 = vcmask 1047559   ;;  %s3799_s22 = smov 64   ;;  %s3800_s7 = smov [#allocation2]  }
   0xa   :  { %3332 = vmatpush3.bf16.msra.mxu1 %v3872_v12  ;;  %3222 = vmatprep.mubr.msk.f32.mxu0 %vm40_vm1, %v28_v13  ;;  %vm178_vm10 = vcmask 261120   ;;  %s3005_s8 = sshll.u32 %s3800_s7, 4  ;;  %s3006_s8 = int_to_ptr.vmem [resolvable:$true] %s3005_s8 }
   0xb   :  { %3333 = vmatprep.subr.bf16.mxu1 %v3795_v5  ;;  %s3771_s9 = scalar_lea.vmem %s3006_s8, 128  ;;  %p3776_p1 = scmp.lt.s32.totalorder %s3006_s8, %s3006_s8 }
   0xc   :  { %3344 = vmatpush3.bf16.msra.mxu0 %v3872_v12  ;;  %p3772_p0 = scmp.ne.s32.totalorder %s3006_s8, %s3771_s9  ;;  %p3777_p2 = scmp.lt.s32.totalorder %s3771_s9, %s3771_s9 }
   0xd   :  { %3237 = vmatmul.mubr.f32.vlgmr.msra.gmra.mrb[0].mxu1 %v3797_v10  ;;  %3223 = vmatmul.mubr.msk.f32.gmra.mrb[4].mxu0 %vm40_vm1, %v29_v14 }
   0xe   :  { %3225 = vmatprep.mubr.msk.f32.mxu0 %vm40_vm1, %v30_v15  ;;  %3335 = vmatpush3.bf16.msra.mxu1 %v3853_v6  ;;  %p3778_p3 = por %p3777_p2, %p3776_p1 }
   0xf   :  { %3336 = vmatprep.subr.bf16.mxu1 %v3795_v5  ;;  %3247 = vmatprep.mubr.msk.f32.mxu1 %vm3796_vm2, %v3797_v10 }
  0x10   :  { %3351 = vmatprep.subr.bf16.mxu0 %v3795_v5  ;;  %p3779_p4 = pnand %p3778_p3, %p3772_p0 }
  0x11   :  { %3226 = vmatmul.mubr.msk.f32.gmra.mrb[6].mxu0 %vm40_vm1, %v31_v16 }
  0x12   :  { %3338 = vmatpush3.bf16.msra.mxu1 %v3872_v12  ;;  %3258 = vmatprep.mubr.msk.f32.mxu0 %vm3796_vm2, %v3797_v10 }
  0x13   :  { %3345 = vmatprep.subr.bf16.mxu1 %v3795_v5 }
  0xd7   :  { %v3218_v17 = vpop.f32.mrb[0].mxu0 }
  0xd8   :  { %v135_v18 = vpop.f32.mrb[1].mxu0  ;;  %v3913_v23 = vadd.f32 %v3218_v17, %v3013_v19 }
  0xd9   :  { %v3911_v22 = vadd.f32 %v3013_v19, %v135_v18 }
  0xdc   :  { %v3221_v20 = vpop.f32.mrb[2].mxu0 }
  0xdd   :  { %v145_v21 = vpop.f32.mrb[3].mxu0  ;;  %v3915_v24 = vadd.f32 %v3221_v20, %v3013_v19 }
  0xde   :  { %v3917_v25 = vadd.f32 %v3013_v19, %v145_v21 }
  0xe0   :  { %v248_v26 = vpop.f32.mrb[0].mxu1  ;;  %v3224_v27 = vpop.f32.mrb[4].mxu0 }
  0xe1   :  { %v253_v28 = vrot.slane %v248_v26, 1  ;;  %v254_v29 = vrot.slane %v248_v26, 2  ;;  %v255_v30 = vrot.slane %v248_v26, 3  ;;  %v3238_v31 = vpop.f32.mrb[1].mxu1  ;;  %v155_v32 = vpop.f32.mrb[5].mxu0  ;;  %v257_v33 = vrot.slane %v248_v26, 5 }
  0xe2   :  { %v268_v34 = vadd.f32 %v248_v26, %v3911_v22  ;;  %v3923_v38 = vadd.f32 %v3224_v27, %v3013_v19  ;;  %v256_v39 = vrot.slane %v248_v26, 4  ;;  %v3925_v41 = vadd.f32 %v3013_v19, %v155_v32 }
  0xe3   :  { %v269_v35 = vadd.f32 %v253_v28, %v3913_v23  ;;  %v270_v36 = vadd.f32 %v254_v29, %v3917_v25  ;;  %v271_v37 = vadd.f32 %v255_v30, %v3915_v24  ;;  %v259_v47 = vrot.slane %v248_v26, 7 }
  0xe4   :  { %v3023_v40 = vmul.f32 -1.442695, %v268_v34  ;;  %v3227_v42 = vpop.f32.mrb[6].mxu0  ;;  %v273_v46 = vadd.f32 %v257_v33, %v3923_v38  ;;  %v272_v48 = vadd.f32 %v256_v39, %v3925_v41  ;;  %v258_v51 = vrot.slane %v248_v26, 6 }
  0xe5   :  { %v3024_v43 = vmul.f32 -1.442695, %v269_v35  ;;  %v3025_v44 = vmul.f32 -1.442695, %v270_v36  ;;  %v3026_v45 = vmul.f32 -1.442695, %v271_v37  ;;  %v3929_v49 = vadd.f32 %v3227_v42, %v3013_v19 }
  0xe6   :  { %3387 = vpow2.f32 %v3023_v40  ;;  %v165_v50 = vpop.f32.mrb[7].mxu0  ;;  %v3028_v52 = vmul.f32 -1.442695, %v273_v46  ;;  %v3027_v54 = vmul.f32 -1.442695, %v272_v48 }
  0xe7   :  { %3389 = vpow2.f32 %v3024_v43  ;;  %v3931_v53 = vadd.f32 %v3013_v19, %v165_v50  ;;  %v275_v55 = vadd.f32 %v259_v47, %v3929_v49 }
  0xe8   :  { %3391 = vpow2.f32 %v3025_v44 }
  0xe9   :  { %3393 = vpow2.f32 %v3026_v45  ;;  %v274_v56 = vadd.f32 %v258_v51, %v3931_v53  ;;  %v3030_v57 = vmul.f32 -1.442695, %v275_v55 }
  0xea   :  { %3395 = vpow2.f32 %v3028_v52 }
  0xeb   :  { %3397 = vpow2.f32 %v3027_v54  ;;  %v3029_v58 = vmul.f32 -1.442695, %v274_v56 }
  0xec   :  { %3399 = vpow2.f32 %v3030_v57 }
  0xed   :  { %3401 = vpow2.f32 %v3029_v58 }
  0xf0   :  { %v3388_v59 = vpop.eup %3387 }
  0xf1   :  { %v3390_v60 = vpop.eup %3389  ;;  %v300_v61 = vadd.f32 1.0, %v3388_v59 }
  0xf2   :  { %v3392_v62 = vpop.eup %3391  ;;  %v301_v63 = vadd.f32 1.0, %v3390_v60 }
  0xf3   :  { %v3394_v0 = vpop.eup %3393  ;;  %v302_v1 = vadd.f32 1.0, %v3392_v62  ;;  %3403 = vrcp.f32 %v300_v61 }
  0xf4   :  { %v3396_v2 = vpop.eup %3395  ;;  %v303_v3 = vadd.f32 1.0, %v3394_v0  ;;  %3405 = vrcp.f32 %v301_v63 }
  0xf5   :  { %v3398_v4 = vpop.eup %3397  ;;  %3407 = vrcp.f32 %v302_v1  ;;  %v305_v7 = vadd.f32 1.0, %v3396_v2 }
  0xf6   :  { %v3400_v8 = vpop.eup %3399  ;;  %3409 = vrcp.f32 %v303_v3  ;;  %v304_v9 = vadd.f32 1.0, %v3398_v4 }
  0xf7   :  { %v3402_v11 = vpop.eup %3401  ;;  %3411 = vrcp.f32 %v305_v7  ;;  %v307_v13 = vadd.f32 1.0, %v3400_v8 }
  0xf8   :  { %3413 = vrcp.f32 %v304_v9  ;;  %v306_v14 = vadd.f32 1.0, %v3402_v11 }
  0xf9   :  { %3415 = vrcp.f32 %v307_v13 }
  0xfa   :  { %3417 = vrcp.f32 %v306_v14 }
  0xfd   :  { %v3935_v15 = vpop.eup %3403 }
  0xfe   :  { %v3937_v16 = vpop.eup %3405  ;;  %v324_v17 = vmul.f32 2.0, %v3935_v15  ;;  %v340_v63 = vmul.f32 0.0, %v3935_v15 }
  0xff   :  { %v3940_v18 = vpop.eup %3407  ;;  %v325_v19 = vmul.f32 2.0, %v3937_v16  ;;  %v341_v2 = vmul.f32 0.0, %v3937_v16 }
 0x100   :  { %v3943_v20 = vpop.eup %3409  ;;  %v3031_v21 = vadd.f32 -1.0, %v324_v17  ;;  %v326_v29 = vmul.f32 2.0, %v3940_v18  ;;  %v342_v4 = vmul.f32 0.0, %v3940_v18 }
 0x101   :  { %v3945_v26 = vpop.eup %3411  ;;  %v3032_v27 = vadd.f32 -1.0, %v325_v19  ;;  %v327_v28 = vmul.f32 2.0, %v3943_v20  ;;  %v343_v13 = vmul.f32 0.0, %v3943_v20 }
 0x102   :  { %v3949_v30 = vpop.eup %3413  ;;  %356 = vrot.lane.b32.xlu1 %v3031_v21, %s3798_s3  ;;  %v329_v32 = vmul.f32 2.0, %v3945_v26  ;;  %v3033_v34 = vadd.f32 -1.0, %v326_v29 }
 0x103   :  { %358 = vrot.lane.b32.xlu0 %v3032_v27, %s3798_s3  ;;  %v3034_v31 = vadd.f32 -1.0, %v327_v28  ;;  %v3954_v33 = vpop.eup %3415  ;;  %v328_v35 = vmul.f32 2.0, %v3949_v30  ;;  %v344_v11 = vmul.f32 0.0, %v3949_v30  ;;  %v345_v28 = vmul.f32 0.0, %v3945_v26 }
 0x104   :  { %v3957_v36 = vpop.eup %3417  ;;  %v3036_v37 = vadd.f32 -1.0, %v329_v32  ;;  %v331_v39 = vmul.f32 2.0, %v3954_v33 }
 0x105   :  { %v3035_v40 = vadd.f32 -1.0, %v328_v35  ;;  %v330_v42 = vmul.f32 2.0, %v3957_v36  ;;  %v346_v27 = vmul.f32 0.0, %v3957_v36 }
 0x106   :  { %362 = vrot.lane.b32.xlu1 %v3034_v31, %s3798_s3  ;;  %v3038_v43 = vadd.f32 -1.0, %v331_v39 }
 0x107   :  { %360 = vrot.lane.b32.xlu0 %v3033_v34, %s3798_s3  ;;  %v3037_v44 = vadd.f32 -1.0, %v330_v42 }
 0x10a   :  { %366 = vrot.lane.b32.xlu1 %v3036_v37, %s3798_s3  ;;  %v347_v37 = vmul.f32 0.0, %v3954_v33 }
 0x10b   :  { %364 = vrot.lane.b32.xlu0 %v3035_v40, %s3798_s3 }
 0x10e   :  { %370 = vrot.lane.b32.xlu1 %v3038_v43, %s3798_s3 }
 0x10f   :  { %368 = vrot.lane.b32.xlu0 %v3037_v44, %s3798_s3 }
 0x174   :  { %v357_v45 = vpop.permute.xlu1 %356 }
 0x175   :  { %v380_v46 = vmul.f32 %v3935_v15, %v357_v45  ;;  %v359_v47 = vpop.permute.xlu0 %358 }
 0x176   :  { %v381_v50 = vmul.f32 %v3937_v16, %v359_v47 }
 0x177   :  { %396 = vrot.lane.b32.xlu0 %v380_v46, %s3798_s3 }
 0x178   :  { %v363_v48 = vpop.permute.xlu1 %362 }
 0x179   :  { %v361_v51 = vpop.permute.xlu0 %360  ;;  %v383_v56 = vmul.f32 %v3943_v20, %v363_v48 }
 0x17a   :  { %v382_v52 = vmul.f32 %v3940_v18, %v361_v51 }
 0x17b   :  { %398 = vrot.lane.b32.xlu0 %v381_v50, %s3798_s3 }
 0x17c   :  { %400 = vrot.lane.b32.xlu1 %v382_v52, %s3798_s3  ;;  %v367_v54 = vpop.permute.xlu1 %366 }
 0x17d   :  { %v365_v55 = vpop.permute.xlu0 %364  ;;  %v385_v59 = vmul.f32 %v3945_v26, %v367_v54 }
 0x17e   :  { %v384_v57 = vmul.f32 %v3949_v30, %v365_v55 }
 0x180   :  { %404 = vrot.lane.b32.xlu0 %v384_v57, %s3798_s3  ;;  %402 = vrot.lane.b32.xlu1 %v383_v56, %s3798_s3  ;;  %v371_v61 = vpop.permute.xlu1 %370 }
 0x181   :  { %v369_v58 = vpop.permute.xlu0 %368  ;;  %v387_v62 = vmul.f32 %v3954_v33, %v371_v61 }
 0x182   :  { %v386_v60 = vmul.f32 %v3957_v36, %v369_v58 }
 0x184   :  { %408 = vrot.lane.b32.xlu0 %v386_v60, %s3798_s3  ;;  %406 = vrot.lane.b32.xlu1 %v385_v59, %s3798_s3 }
 0x188   :  { %410 = vrot.lane.b32.xlu1 %v387_v62, %s3798_s3 }
 0x1e9   :  { %v397_v0 = vpop.permute.xlu0 %396 }
 0x1ea   :  { %v3984_v1 = vadd.f32 %v397_v0, %v340_v63 }
 0x1ec   :  { %3419 = vtanh.f32 %v3984_v1 }
 0x1ed   :  { %v399_v3 = vpop.permute.xlu0 %398 }
 0x1ee   :  { %v3989_v7 = vadd.f32 %v399_v3, %v341_v2  ;;  %v401_v8 = vpop.permute.xlu1 %400 }
 0x1ef   :  { %v3991_v9 = vadd.f32 %v401_v8, %v342_v4 }
 0x1f0   :  { %3421 = vtanh.f32 %v3989_v7 }
 0x1f1   :  { %3423 = vtanh.f32 %v3991_v9 }
 0x1f2   :  { %v405_v14 = vpop.permute.xlu0 %404  ;;  %v403_v17 = vpop.permute.xlu1 %402 }
 0x1f3   :  { %v3997_v19 = vadd.f32 %v405_v14, %v344_v11  ;;  %v3999_v21 = vadd.f32 %v403_v17, %v343_v13 }
 0x1f5   :  { %3425 = vtanh.f32 %v3997_v19 }
 0x1f6   :  { %v3420_v29 = vpop.eup %3419  ;;  %3427 = vtanh.f32 %v3999_v21  ;;  %v409_v31 = vpop.permute.xlu0 %408 }
 0x1f7   :  { %v407_v32 = vpop.permute.xlu1 %406  ;;  %444 = vrot.lane.b32.xlu0 %v3420_v29, %s3798_s3  ;;  %v4006_v34 = vadd.f32 %v409_v31, %v346_v27 }
 0x1f8   :  { %v4008_v35 = vadd.f32 %v407_v32, %v345_v28 }
 0x1f9   :  { %3429 = vtanh.f32 %v4006_v34 }
 0x1fa   :  { %v3422_v39 = vpop.eup %3421  ;;  %3431 = vtanh.f32 %v4008_v35 }
 0x1fb   :  { %v411_v40 = vpop.permute.xlu1 %410  ;;  %v3424_v42 = vpop.eup %3423  ;;  %446 = vrot.lane.b32.xlu0 %v3422_v39, %s3798_s3 }
 0x1fc   :  { %v4014_v43 = vadd.f32 %v411_v40, %v347_v37  ;;  %448 = vrot.lane.b32.xlu1 %v3424_v42, %s3798_s3 }
 0x1fe   :  { %3433 = vtanh.f32 %v4014_v43 }
 0x1ff   :  { %v3426_v44 = vpop.eup %3425 }
 0x200   :  { %v3428_v45 = vpop.eup %3427  ;;  %452 = vrot.lane.b32.xlu0 %v3426_v44, %s3798_s3 }
 0x201   :  { %450 = vrot.lane.b32.xlu1 %v3428_v45, %s3798_s3 }
 0x203   :  { %v3430_v46 = vpop.eup %3429 }
 0x204   :  { %v3432_v47 = vpop.eup %3431  ;;  %456 = vrot.lane.b32.xlu0 %v3430_v46, %s3798_s3 }
 0x205   :  { %454 = vrot.lane.b32.xlu1 %v3432_v47, %s3798_s3 }
 0x208   :  { %v3434_v48 = vpop.eup %3433 }
 0x209   :  { %458 = vrot.lane.b32.xlu1 %v3434_v48, %s3798_s3 }
 0x269   :  { %v445_v50 = vpop.permute.xlu0 %444 }
 0x26a   :  { %v468_v57 = vmul.f32 %v3935_v15, %v445_v50 }
 0x26d   :  { %v447_v51 = vpop.permute.xlu0 %446 }
 0x26e   :  { %v469_v52 = vmul.f32 %v3937_v16, %v447_v51  ;;  %v449_v54 = vpop.permute.xlu1 %448 }
 0x26f   :  { %v470_v55 = vmul.f32 %v3940_v18, %v449_v54 }
 0x270   :  { %v484_v56 = vrot.slane %v469_v52, 7 }
 0x271   :  { %v487_v59 = vrot.slane %v470_v55, 6 }
 0x272   :  { %v453_v58 = vpop.permute.xlu0 %452  ;;  %v486_v62 = vsel %vm485_vm3, %v484_v56, %v468_v57 }
 0x273   :  { %v472_v60 = vmul.f32 %v3949_v30, %v453_v58  ;;  %v451_v61 = vpop.permute.xlu1 %450  ;;  %v489_v2 = vsel %vm488_vm4, %v487_v59, %v486_v62 }
 0x274   :  { %v471_v63 = vmul.f32 %v3943_v20, %v451_v61 }
 0x275   :  { %v493_v18 = vrot.slane %v472_v60, 4 }
 0x276   :  { %v490_v0 = vrot.slane %v471_v63, 5  ;;  %v457_v16 = vpop.permute.xlu0 %456 }
 0x277   :  { %v474_v3 = vmul.f32 %v3957_v36, %v457_v16  ;;  %v455_v4 = vpop.permute.xlu1 %454 }
 0x278   :  { %v492_v15 = vsel %vm491_vm5, %v490_v0, %v489_v2  ;;  %v473_v8 = vmul.f32 %v3945_v26, %v455_v4 }
 0x279   :  { %v499_v11 = vrot.slane %v474_v3, 2  ;;  %v495_v20 = vsel %vm494_vm6, %v493_v18, %v492_v15 }
 0x27a   :  { %v496_v30 = vrot.slane %v473_v8, 3 }
 0x27b   :  { %v459_v13 = vpop.permute.xlu1 %458 }
 0x27c   :  { %v475_v14 = vmul.f32 %v3954_v33, %v459_v13  ;;  %v498_v17 = vsel %vm497_vm7, %v496_v30, %v495_v20 }
 0x27d   :  { %v501_v36 = vsel %vm500_vm8, %v499_v11, %v498_v17 }
 0x27e   :  { %v502_v27 = vrot.slane %v475_v14, 1 }
 0x280   :  { %v504_v28 = vsel %vm503_vm9, %v502_v27, %v501_v36 }
 0x281   :  { %505 = vrot.lane.b32.xlu0 %v504_v28, %s3799_s22 }
 0x2f3   :  { %v506_v26 = vpop.permute.xlu0 %505 }
 0x2f4   :  { %3248 = vmatmul.mubr.msk.f32.vlgmr.msra.gmra.mrb[2].mxu1 %vm178_vm10, %v506_v26 }
 0x2f5   :  { %3347 = vmatpush3.bf16.msra.mxu1 %v3853_v6  ;;  %3269 = vmatprep.mubr.msk.f32.mxu1 %vm3796_vm2, %v3797_v10 }
 0x2f6   :  { %3348 = vmatprep.subr.bf16.mxu1 %v3795_v5 }
 0x2f9   :  { %3350 = vmatpush3.bf16.msra.mxu1 %v3872_v12 }
 0x2fa   :  { %3357 = vmatprep.subr.bf16.mxu1 %v3795_v5 }
 0x3c7   :  { %v575_v33 = vpop.f32.mrb[2].mxu1 }
 0x3c8   :  { %v580_v29 = vrot.slane %v575_v33, 7  ;;  %v581_v31 = vrot.slane %v575_v33, 1  ;;  %v582_v32 = vrot.slane %v575_v33, 2  ;;  %v583_v37 = vrot.slane %v575_v33, 3  ;;  %v3249_v39 = vpop.f32.mrb[3].mxu1 }
 0x3c9   :  { %v584_v40 = vrot.slane %v575_v33, 4  ;;  %v585_v42 = vrot.slane %v575_v33, 5  ;;  %v586_v44 = vrot.slane %v575_v33, 6  ;;  %v596_v45 = vadd.f32 %v575_v33, %v3913_v23 }
 0x3ca   :  { %v595_v46 = vadd.f32 %v580_v29, %v3911_v22  ;;  %v597_v47 = vadd.f32 %v581_v31, %v3917_v25  ;;  %v598_v48 = vadd.f32 %v582_v32, %v3915_v24  ;;  %v599_v50 = vadd.f32 %v583_v37, %v3925_v41 }
 0x3cb   :  { %v600_v51 = vadd.f32 %v584_v40, %v3923_v38  ;;  %v601_v52 = vadd.f32 %v585_v42, %v3931_v53  ;;  %v3041_v54 = vmul.f32 -1.442695, %v596_v45  ;;  %v602_v55 = vadd.f32 %v586_v44, %v3929_v49 }
 0x3cc   :  { %v3040_v56 = vmul.f32 -1.442695, %v595_v46  ;;  %v3042_v57 = vmul.f32 -1.442695, %v597_v47  ;;  %v3043_v58 = vmul.f32 -1.442695, %v598_v48 }
 0x3cd   :  { %3435 = vpow2.f32 %v3041_v54  ;;  %v3044_v59 = vmul.f32 -1.442695, %v599_v50  ;;  %v3045_v60 = vmul.f32 -1.442695, %v600_v51  ;;  %v3046_v61 = vmul.f32 -1.442695, %v601_v52 }
 0x3ce   :  { %3437 = vpow2.f32 %v3040_v56  ;;  %v3047_v62 = vmul.f32 -1.442695, %v602_v55 }
 0x3cf   :  { %3439 = vpow2.f32 %v3042_v57 }
 0x3d0   :  { %3441 = vpow2.f32 %v3043_v58 }
 0x3d1   :  { %3443 = vpow2.f32 %v3044_v59 }
 0x3d2   :  { %3445 = vpow2.f32 %v3045_v60 }
 0x3d3   :  { %3447 = vpow2.f32 %v3046_v61 }
 0x3d4   :  { %3449 = vpow2.f32 %v3047_v62 }
 0x3d7   :  { %v3436_v63 = vpop.eup %3435 }
 0x3d8   :  { %v3438_v0 = vpop.eup %3437  ;;  %v628_v16 = vadd.f32 1.0, %v3436_v63 }
 0x3d9   :  { %v3440_v2 = vpop.eup %3439  ;;  %v627_v18 = vadd.f32 1.0, %v3438_v0 }
 0x3da   :  { %v3442_v3 = vpop.eup %3441  ;;  %v629_v4 = vadd.f32 1.0, %v3440_v2  ;;  %3451 = vrcp.f32 %v628_v16 }
 0x3db   :  { %v3444_v15 = vpop.eup %3443  ;;  %v630_v8 = vadd.f32 1.0, %v3442_v3  ;;  %3453 = vrcp.f32 %v627_v18 }
 0x3dc   :  { %v3446_v30 = vpop.eup %3445  ;;  %v631_v11 = vadd.f32 1.0, %v3444_v15  ;;  %3455 = vrcp.f32 %v629_v4 }
 0x3dd   :  { %v3448_v13 = vpop.eup %3447  ;;  %v632_v20 = vadd.f32 1.0, %v3446_v30  ;;  %3457 = vrcp.f32 %v630_v8 }
 0x3de   :  { %v3450_v14 = vpop.eup %3449  ;;  %v633_v17 = vadd.f32 1.0, %v3448_v13  ;;  %3459 = vrcp.f32 %v631_v11 }
 0x3df   :  { %v634_v27 = vadd.f32 1.0, %v3450_v14  ;;  %3461 = vrcp.f32 %v632_v20  ;;  %v676_v20 = vrot.slane %v3989_v7, 7  ;;  %v677_v14 = vrot.slane %v3991_v9, 7 }
 0x3e0   :  { %3463 = vrcp.f32 %v633_v17  ;;  %v679_v9 = vrot.slane %v3997_v19, 7 }
 0x3e1   :  { %3465 = vrcp.f32 %v634_v27 }
 0x3e4   :  { %v4054_v36 = vpop.eup %3451 }
 0x3e5   :  { %v4056_v28 = vpop.eup %3453  ;;  %v652_v26 = vmul.f32 2.0, %v4054_v36  ;;  %v692_v17 = vmul.f32 %v4054_v36, %v676_v20 }
 0x3e6   :  { %v4059_v33 = vpop.eup %3455  ;;  %v651_v37 = vmul.f32 2.0, %v4056_v28 }
 0x3e7   :  { %v4061_v29 = vpop.eup %3457  ;;  %v3049_v31 = vadd.f32 -1.0, %v652_v26  ;;  %v653_v32 = vmul.f32 2.0, %v4059_v33  ;;  %v675_v26 = vrot.slane %v3984_v1, 7 }
 0x3e8   :  { %v4065_v39 = vpop.eup %3459  ;;  %v654_v42 = vmul.f32 2.0, %v4061_v29  ;;  %v3048_v45 = vadd.f32 -1.0, %v651_v37 }
 0x3e9   :  { %709 = vrot.lane.b32.xlu1 %v3049_v31, %s3798_s3  ;;  %v3050_v40 = vadd.f32 -1.0, %v653_v32  ;;  %v4069_v44 = vpop.eup %3461  ;;  %v655_v46 = vmul.f32 2.0, %v4065_v39  ;;  %v693_v32 = vmul.f32 %v4059_v33, %v677_v14  ;;  %v691_v7 = vmul.f32 %v4056_v28, %v675_v26 }
 0x3ea   :  { %v4073_v47 = vpop.eup %3463  ;;  %v3051_v48 = vadd.f32 -1.0, %v654_v42  ;;  %v656_v50 = vmul.f32 2.0, %v4069_v44 }
 0x3eb   :  { %711 = vrot.lane.b32.xlu0 %v3050_v40, %s3798_s3  ;;  %v4077_v51 = vpop.eup %3465  ;;  %v3052_v52 = vadd.f32 -1.0, %v655_v46  ;;  %v657_v54 = vmul.f32 2.0, %v4073_v47  ;;  %v678_v40 = vrot.slane %v3999_v21, 7 }
 0x3ec   :  { %v3053_v55 = vadd.f32 -1.0, %v656_v50  ;;  %v658_v56 = vmul.f32 2.0, %v4077_v51  ;;  %v680_v50 = vrot.slane %v4008_v35, 7 }
 0x3ed   :  { %707 = vrot.lane.b32.xlu1 %v3048_v45, %s3798_s3  ;;  %v3054_v57 = vadd.f32 -1.0, %v657_v54  ;;  %v694_v1 = vmul.f32 %v4061_v29, %v678_v40 }
 0x3ee   :  { %v3055_v58 = vadd.f32 -1.0, %v658_v56  ;;  %v696_v56 = vmul.f32 %v4069_v44, %v680_v50 }
 0x3ef   :  { %713 = vrot.lane.b32.xlu0 %v3051_v48, %s3798_s3 }
 0x3f1   :  { %715 = vrot.lane.b32.xlu1 %v3052_v52, %s3798_s3  ;;  %v695_v52 = vmul.f32 %v4065_v39, %v679_v9 }
 0x3f3   :  { %717 = vrot.lane.b32.xlu0 %v3053_v55, %s3798_s3  ;;  %v681_v55 = vrot.slane %v4006_v34, 7 }
 0x3f5   :  { %719 = vrot.lane.b32.xlu1 %v3054_v57, %s3798_s3 }
 0x3f7   :  { %721 = vrot.lane.b32.xlu0 %v3055_v58, %s3798_s3  ;;  %v682_v58 = vrot.slane %v4014_v43, 7 }
 0x45b   :  { %v710_v59 = vpop.permute.xlu1 %709 }
 0x45c   :  { %v732_v60 = vmul.f32 %v4054_v36, %v710_v59  ;;  %v697_v59 = vmul.f32 %v4073_v47, %v681_v55 }
 0x45d   :  { %v712_v61 = vpop.permute.xlu0 %711 }
 0x45e   :  { %v733_v62 = vmul.f32 %v4059_v33, %v712_v61  ;;  %749 = vrot.lane.b32.xlu1 %v732_v60, %s3798_s3 }
 0x45f   :  { %v708_v63 = vpop.permute.xlu1 %707 }
 0x460   :  { %v731_v0 = vmul.f32 %v4056_v28, %v708_v63  ;;  %751 = vrot.lane.b32.xlu0 %v733_v62, %s3798_s3  ;;  %v698_v62 = vmul.f32 %v4077_v51, %v682_v58 }
 0x461   :  { %v714_v16 = vpop.permute.xlu0 %713 }
 0x462   :  { %v734_v2 = vmul.f32 %v4061_v29, %v714_v16  ;;  %747 = vrot.lane.b32.xlu1 %v731_v0, %s3798_s3 }
 0x463   :  { %v716_v18 = vpop.permute.xlu1 %715 }
 0x464   :  { %v735_v3 = vmul.f32 %v4065_v39, %v716_v18  ;;  %753 = vrot.lane.b32.xlu0 %v734_v2, %s3798_s3 }
 0x465   :  { %v718_v4 = vpop.permute.xlu0 %717 }
 0x466   :  { %v736_v15 = vmul.f32 %v4069_v44, %v718_v4  ;;  %755 = vrot.lane.b32.xlu1 %v735_v3, %s3798_s3 }
 0x467   :  { %v720_v8 = vpop.permute.xlu1 %719 }
 0x468   :  { %v737_v30 = vmul.f32 %v4073_v47, %v720_v8  ;;  %757 = vrot.lane.b32.xlu0 %v736_v15, %s3798_s3 }
 0x469   :  { %v722_v11 = vpop.permute.xlu0 %721 }
 0x46a   :  { %v738_v13 = vmul.f32 %v4077_v51, %v722_v11  ;;  %759 = vrot.lane.b32.xlu1 %v737_v30, %s3798_s3 }
 0x46c   :  { %761 = vrot.lane.b32.xlu0 %v738_v13, %s3798_s3 }
 0x4d0   :  { %v750_v27 = vpop.permute.xlu1 %749 }
 0x4d1   :  { %v4106_v31 = vadd.f32 %v750_v27, %v692_v17 }
 0x4d2   :  { %v752_v37 = vpop.permute.xlu0 %751 }
 0x4d3   :  { %3467 = vtanh.f32 %v4106_v31  ;;  %v4111_v42 = vadd.f32 %v752_v37, %v693_v32 }
 0x4d4   :  { %v748_v45 = vpop.permute.xlu1 %747 }
 0x4d5   :  { %3469 = vtanh.f32 %v4111_v42  ;;  %v4116_v46 = vadd.f32 %v748_v45, %v691_v7 }
 0x4d6   :  { %v754_v48 = vpop.permute.xlu0 %753 }
 0x4d7   :  { %3471 = vtanh.f32 %v4116_v46  ;;  %v4121_v21 = vadd.f32 %v754_v48, %v694_v1 }
 0x4d8   :  { %v756_v54 = vpop.permute.xlu1 %755 }
 0x4d9   :  { %3473 = vtanh.f32 %v4121_v21  ;;  %v4126_v19 = vadd.f32 %v756_v54, %v695_v52 }
 0x4da   :  { %v758_v57 = vpop.permute.xlu0 %757 }
 0x4db   :  { %3475 = vtanh.f32 %v4126_v19  ;;  %v4131_v35 = vadd.f32 %v758_v57, %v696_v56 }
 0x4dc   :  { %v760_v60 = vpop.permute.xlu1 %759 }
 0x4dd   :  { %v3468_v61 = vpop.eup %3467  ;;  %3477 = vtanh.f32 %v4131_v35  ;;  %v4135_v34 = vadd.f32 %v760_v60, %v697_v59 }
 0x4de   :  { %v762_v63 = vpop.permute.xlu0 %761  ;;  %797 = vrot.lane.b32.xlu1 %v3468_v61, %s3798_s3 }
 0x4df   :  { %v3470_v0 = vpop.eup %3469  ;;  %3479 = vtanh.f32 %v4135_v34  ;;  %v4140_v43 = vadd.f32 %v762_v63, %v698_v62 }
 0x4e0   :  { %799 = vrot.lane.b32.xlu0 %v3470_v0, %s3798_s3 }
 0x4e1   :  { %v3472_v16 = vpop.eup %3471  ;;  %3481 = vtanh.f32 %v4140_v43 }
 0x4e2   :  { %795 = vrot.lane.b32.xlu1 %v3472_v16, %s3798_s3 }
 0x4e3   :  { %v3474_v2 = vpop.eup %3473 }
 0x4e4   :  { %801 = vrot.lane.b32.xlu0 %v3474_v2, %s3798_s3 }
 0x4e5   :  { %v3476_v18 = vpop.eup %3475 }
 0x4e6   :  { %803 = vrot.lane.b32.xlu1 %v3476_v18, %s3798_s3 }
 0x4e7   :  { %v3478_v3 = vpop.eup %3477 }
 0x4e8   :  { %805 = vrot.lane.b32.xlu0 %v3478_v3, %s3798_s3 }
 0x4e9   :  { %v3480_v4 = vpop.eup %3479 }
 0x4ea   :  { %807 = vrot.lane.b32.xlu1 %v3480_v4, %s3798_s3 }
 0x4eb   :  { %v3482_v15 = vpop.eup %3481 }
 0x4ec   :  { %809 = vrot.lane.b32.xlu0 %v3482_v15, %s3798_s3 }
 0x550   :  { %v798_v8 = vpop.permute.xlu1 %797 }
 0x551   :  { %v820_v17 = vmul.f32 %v4054_v36, %v798_v8 }
 0x552   :  { %v800_v30 = vpop.permute.xlu0 %799 }
 0x553   :  { %v821_v11 = vmul.f32 %v4059_v33, %v800_v30 }
 0x554   :  { %v796_v13 = vpop.permute.xlu1 %795 }
 0x555   :  { %v819_v20 = vmul.f32 %v4056_v28, %v796_v13  ;;  %v837_v32 = vrot.slane %v821_v11, 7 }
 0x556   :  { %v802_v14 = vpop.permute.xlu0 %801 }
 0x557   :  { %v835_v27 = vrot.slane %v819_v20, 1  ;;  %v822_v26 = vmul.f32 %v4061_v29, %v802_v14 }
 0x558   :  { %v804_v37 = vpop.permute.xlu1 %803 }
 0x559   :  { %v836_v40 = vsel %vm485_vm3, %v820_v17, %v835_v27  ;;  %v839_v7 = vrot.slane %v822_v26, 6  ;;  %v823_v45 = vmul.f32 %v4065_v39, %v804_v37 }
 0x55a   :  { %v838_v9 = vsel %vm488_vm4, %v837_v32, %v836_v40  ;;  %v806_v1 = vpop.permute.xlu0 %805 }
 0x55b   :  { %v840_v33 = vsel %vm491_vm5, %v839_v7, %v838_v9  ;;  %v841_v48 = vrot.slane %v823_v45, 5  ;;  %v824_v28 = vmul.f32 %v4069_v44, %v806_v1 }
 0x55c   :  { %v808_v50 = vpop.permute.xlu1 %807 }
 0x55d   :  { %v842_v36 = vsel %vm494_vm6, %v841_v48, %v840_v33  ;;  %v843_v52 = vrot.slane %v824_v28, 4  ;;  %v825_v29 = vmul.f32 %v4073_v47, %v808_v50 }
 0x55e   :  { %v810_v54 = vpop.permute.xlu0 %809 }
 0x55f   :  { %v845_v55 = vrot.slane %v825_v29, 3  ;;  %v826_v56 = vmul.f32 %v4077_v51, %v810_v54  ;;  %v844_v39 = vsel %vm497_vm7, %v843_v52, %v842_v36 }
 0x561   :  { %v847_v57 = vrot.slane %v826_v56, 2  ;;  %v846_v58 = vsel %vm500_vm8, %v845_v55, %v844_v39 }
 0x563   :  { %v848_v59 = vsel %vm503_vm9, %v847_v57, %v846_v58 }
 0x564   :  { %849 = vrot.lane.b32.xlu1 %v848_v59, %s3799_s22 }
 0x5d6   :  { %v850_v44 = vpop.permute.xlu1 %849 }
 0x5d7   :  { %3259 = vmatmul.mubr.msk.f32.vlgmr.msra.gmra.mrb[8].mxu0 %vm178_vm10, %v850_v44 }
 0x5d8   :  { %3353 = vmatpush3.bf16.msra.mxu0 %v3853_v6  ;;  %3280 = vmatprep.mubr.msk.f32.mxu0 %vm3796_vm2, %v3797_v10 }
 0x5d9   :  { %3354 = vmatprep.subr.bf16.mxu0 %v3795_v5 }
 0x5dc   :  { %3356 = vmatpush3.bf16.msra.mxu0 %v3872_v12 }
 0x5dd   :  { %3363 = vmatprep.subr.bf16.mxu0 %v3795_v5 }
 0x6aa   :  { %v919_v47 = vpop.f32.mrb[8].mxu0 }
 0x6ab   :  { %v924_v51 = vrot.slane %v919_v47, 6  ;;  %v925_v60 = vrot.slane %v919_v47, 7  ;;  %v926_v61 = vrot.slane %v919_v47, 1  ;;  %v927_v62 = vrot.slane %v919_v47, 2  ;;  %v3260_v63 = vpop.f32.mrb[9].mxu0 }
 0x6ac   :  { %v928_v0 = vrot.slane %v919_v47, 3  ;;  %v929_v16 = vrot.slane %v919_v47, 4  ;;  %v930_v2 = vrot.slane %v919_v47, 5  ;;  %v941_v18 = vadd.f32 %v919_v47, %v3917_v25 }
 0x6ad   :  { %v939_v3 = vadd.f32 %v924_v51, %v3911_v22  ;;  %v940_v4 = vadd.f32 %v925_v60, %v3913_v23  ;;  %v942_v15 = vadd.f32 %v926_v61, %v3915_v24  ;;  %v943_v8 = vadd.f32 %v927_v62, %v3925_v41 }
 0x6ae   :  { %v944_v30 = vadd.f32 %v928_v0, %v3923_v38  ;;  %v945_v11 = vadd.f32 %v929_v16, %v3931_v53  ;;  %v3059_v13 = vmul.f32 -1.442695, %v941_v18  ;;  %v946_v20 = vadd.f32 %v930_v2, %v3929_v49 }
 0x6af   :  { %v3057_v14 = vmul.f32 -1.442695, %v939_v3  ;;  %v3058_v17 = vmul.f32 -1.442695, %v940_v4  ;;  %v3060_v27 = vmul.f32 -1.442695, %v942_v15 }
 0x6b0   :  { %3483 = vpow2.f32 %v3059_v13  ;;  %v3061_v26 = vmul.f32 -1.442695, %v943_v8  ;;  %v3062_v32 = vmul.f32 -1.442695, %v944_v30  ;;  %v3063_v37 = vmul.f32 -1.442695, %v945_v11 }
 0x6b1   :  { %3485 = vpow2.f32 %v3057_v14  ;;  %v3064_v40 = vmul.f32 -1.442695, %v946_v20 }
 0x6b2   :  { %3487 = vpow2.f32 %v3058_v17 }
 0x6b3   :  { %3489 = vpow2.f32 %v3060_v27 }
 0x6b4   :  { %3491 = vpow2.f32 %v3061_v26 }
 0x6b5   :  { %3493 = vpow2.f32 %v3062_v32 }
 0x6b6   :  { %3495 = vpow2.f32 %v3063_v37 }
 0x6b7   :  { %3497 = vpow2.f32 %v3064_v40 }
 0x6ba   :  { %v3484_v7 = vpop.eup %3483 }
 0x6bb   :  { %v3486_v45 = vpop.eup %3485  ;;  %v973_v9 = vadd.f32 1.0, %v3484_v7 }
 0x6bc   :  { %v3488_v1 = vpop.eup %3487  ;;  %v971_v33 = vadd.f32 1.0, %v3486_v45 }
 0x6bd   :  { %v3490_v48 = vpop.eup %3489  ;;  %v972_v28 = vadd.f32 1.0, %v3488_v1  ;;  %3499 = vrcp.f32 %v973_v9 }
 0x6be   :  { %v3492_v50 = vpop.eup %3491  ;;  %v974_v36 = vadd.f32 1.0, %v3490_v48  ;;  %3501 = vrcp.f32 %v971_v33 }
 0x6bf   :  { %v3494_v52 = vpop.eup %3493  ;;  %v975_v29 = vadd.f32 1.0, %v3492_v50  ;;  %3503 = vrcp.f32 %v972_v28 }
 0x6c0   :  { %v3496_v54 = vpop.eup %3495  ;;  %v976_v55 = vadd.f32 1.0, %v3494_v52  ;;  %3505 = vrcp.f32 %v974_v36 }
 0x6c1   :  { %v3498_v56 = vpop.eup %3497  ;;  %3507 = vrcp.f32 %v975_v29  ;;  %v977_v39 = vadd.f32 1.0, %v3496_v54 }
 0x6c2   :  { %v978_v57 = vadd.f32 1.0, %v3498_v56  ;;  %3509 = vrcp.f32 %v976_v55  ;;  %v1021_v55 = vrot.slane %v4111_v42, 7  ;;  %v1019_v56 = vrot.slane %v4116_v46, 7 }
 0x6c4   :  { %3511 = vrcp.f32 %v978_v57 }
 0x6c5   :  { %3513 = vrcp.f32 %v977_v39 }
 0x6c7   :  { %v4181_v58 = vpop.eup %3499 }
 0x6c8   :  { %v4183_v59 = vpop.eup %3501  ;;  %v997_v44 = vmul.f32 2.0, %v4181_v58  ;;  %v1037_v39 = vmul.f32 %v4181_v58, %v1021_v55 }
 0x6c9   :  { %v4186_v47 = vpop.eup %3503  ;;  %v995_v51 = vmul.f32 2.0, %v4183_v59 }
 0x6ca   :  { %v4189_v60 = vpop.eup %3505  ;;  %v3067_v61 = vadd.f32 -1.0, %v997_v44  ;;  %v996_v62 = vmul.f32 2.0, %v4186_v47  ;;  %v1035_v44 = vmul.f32 %v4183_v59, %v1019_v56 }
 0x6cb   :  { %v4192_v63 = vpop.eup %3507  ;;  %v3065_v0 = vadd.f32 -1.0, %v995_v51  ;;  %v998_v16 = vmul.f32 2.0, %v4189_v60  ;;  %v1020_v51 = vrot.slane %v4106_v31, 7 }
 0x6cc   :  { %v4195_v2 = vpop.eup %3509  ;;  %1055 = vrot.lane.b32.xlu1 %v3067_v61, %s3798_s3  ;;  %v3066_v18 = vadd.f32 -1.0, %v996_v62  ;;  %v999_v8 = vmul.f32 2.0, %v4192_v63 }
 0x6cd   :  { %1051 = vrot.lane.b32.xlu0 %v3065_v0, %s3798_s3  ;;  %v1000_v3 = vmul.f32 2.0, %v4195_v2  ;;  %v3068_v15 = vadd.f32 -1.0, %v998_v16  ;;  %v1022_v0 = vrot.slane %v4121_v21, 7  ;;  %v1036_v42 = vmul.f32 %v4186_v47, %v1020_v51 }
 0x6ce   :  { %v4200_v4 = vpop.eup %3511  ;;  %v3069_v20 = vadd.f32 -1.0, %v999_v8  ;;  %v1023_v8 = vrot.slane %v4126_v19, 7 }
 0x6cf   :  { %v4203_v30 = vpop.eup %3513  ;;  %v3070_v11 = vadd.f32 -1.0, %v1000_v3  ;;  %v1002_v13 = vmul.f32 2.0, %v4200_v4  ;;  %v1024_v3 = vrot.slane %v4131_v35, 7 }
 0x6d0   :  { %1053 = vrot.lane.b32.xlu1 %v3066_v18, %s3798_s3  ;;  %v1001_v14 = vmul.f32 2.0, %v4203_v30  ;;  %v1038_v18 = vmul.f32 %v4189_v60, %v1022_v0 }
 0x6d1   :  { %1057 = vrot.lane.b32.xlu0 %v3068_v15, %s3798_s3  ;;  %v3072_v17 = vadd.f32 -1.0, %v1002_v13  ;;  %v1040_v21 = vmul.f32 %v4195_v2, %v1024_v3 }
 0x6d2   :  { %v3071_v27 = vadd.f32 -1.0, %v1001_v14  ;;  %v1026_v14 = vrot.slane %v4140_v43, 7 }
 0x6d4   :  { %1061 = vrot.lane.b32.xlu1 %v3070_v11, %s3798_s3  ;;  %v1042_v19 = vmul.f32 %v4200_v4, %v1026_v14 }
 0x6d5   :  { %1059 = vrot.lane.b32.xlu0 %v3069_v20, %s3798_s3  ;;  %v1039_v20 = vmul.f32 %v4192_v63, %v1023_v8 }
 0x6d8   :  { %1065 = vrot.lane.b32.xlu1 %v3072_v17, %s3798_s3 }
 0x6d9   :  { %1063 = vrot.lane.b32.xlu0 %v3071_v27, %s3798_s3  ;;  %v1025_v27 = vrot.slane %v4135_v34, 7 }
 0x73e   :  { %v1056_v26 = vpop.permute.xlu1 %1055 }
 0x73f   :  { %v1077_v32 = vmul.f32 %v4181_v58, %v1056_v26  ;;  %v1052_v37 = vpop.permute.xlu0 %1051 }
 0x740   :  { %v1075_v40 = vmul.f32 %v4183_v59, %v1052_v37  ;;  %v1041_v37 = vmul.f32 %v4203_v30, %v1025_v27 }
 0x741   :  { %1095 = vrot.lane.b32.xlu1 %v1077_v32, %s3798_s3 }
 0x742   :  { %v1054_v7 = vpop.permute.xlu1 %1053  ;;  %1091 = vrot.lane.b32.xlu0 %v1075_v40, %s3798_s3 }
 0x743   :  { %v1076_v45 = vmul.f32 %v4186_v47, %v1054_v7  ;;  %v1058_v9 = vpop.permute.xlu0 %1057 }
 0x744   :  { %v1078_v1 = vmul.f32 %v4189_v60, %v1058_v9 }
 0x745   :  { %1093 = vrot.lane.b32.xlu1 %v1076_v45, %s3798_s3 }
 0x746   :  { %v1062_v33 = vpop.permute.xlu1 %1061  ;;  %1097 = vrot.lane.b32.xlu0 %v1078_v1, %s3798_s3 }
 0x747   :  { %v1080_v48 = vmul.f32 %v4195_v2, %v1062_v33  ;;  %v1060_v28 = vpop.permute.xlu0 %1059 }
 0x748   :  { %v1079_v50 = vmul.f32 %v4192_v63, %v1060_v28 }
 0x749   :  { %1101 = vrot.lane.b32.xlu1 %v1080_v48, %s3798_s3 }
 0x74a   :  { %v1066_v36 = vpop.permute.xlu1 %1065  ;;  %1099 = vrot.lane.b32.xlu0 %v1079_v50, %s3798_s3 }
 0x74b   :  { %v1082_v52 = vmul.f32 %v4200_v4, %v1066_v36  ;;  %v1064_v29 = vpop.permute.xlu0 %1063 }
 0x74c   :  { %v1081_v54 = vmul.f32 %v4203_v30, %v1064_v29 }
 0x74d   :  { %1105 = vrot.lane.b32.xlu1 %v1082_v52, %s3798_s3 }
 0x74e   :  { %1103 = vrot.lane.b32.xlu0 %v1081_v54, %s3798_s3 }
 0x7b3   :  { %v1096_v57 = vpop.permute.xlu1 %1095 }
 0x7b4   :  { %v4234_v61 = vadd.f32 %v1096_v57, %v1037_v39  ;;  %v1092_v62 = vpop.permute.xlu0 %1091 }
 0x7b5   :  { %v4237_v16 = vadd.f32 %v1092_v62, %v1035_v44 }
 0x7b6   :  { %3515 = vtanh.f32 %v4234_v61 }
 0x7b7   :  { %3517 = vtanh.f32 %v4237_v16  ;;  %v1094_v46 = vpop.permute.xlu1 %1093 }
 0x7b8   :  { %v4244_v15 = vadd.f32 %v1094_v46, %v1036_v42  ;;  %v1098_v31 = vpop.permute.xlu0 %1097 }
 0x7b9   :  { %v4247_v11 = vadd.f32 %v1098_v31, %v1038_v18 }
 0x7ba   :  { %3519 = vtanh.f32 %v4244_v15 }
 0x7bb   :  { %3521 = vtanh.f32 %v4247_v11  ;;  %v1102_v13 = vpop.permute.xlu1 %1101 }
 0x7bc   :  { %v4254_v17 = vadd.f32 %v1102_v13, %v1040_v21  ;;  %v1100_v35 = vpop.permute.xlu0 %1099 }
 0x7bd   :  { %v4257_v26 = vadd.f32 %v1100_v35, %v1039_v20 }
 0x7be   :  { %3523 = vtanh.f32 %v4254_v17 }
 0x7bf   :  { %3525 = vtanh.f32 %v4257_v26  ;;  %v1106_v32 = vpop.permute.xlu1 %1105 }
 0x7c0   :  { %v3516_v40 = vpop.eup %3515  ;;  %v4263_v7 = vadd.f32 %v1106_v32, %v1042_v19  ;;  %v1104_v43 = vpop.permute.xlu0 %1103 }
 0x7c1   :  { %v3518_v45 = vpop.eup %3517  ;;  %1143 = vrot.lane.b32.xlu1 %v3516_v40, %s3798_s3  ;;  %v4266_v9 = vadd.f32 %v1104_v43, %v1041_v37 }
 0x7c2   :  { %3527 = vtanh.f32 %v4263_v7  ;;  %1139 = vrot.lane.b32.xlu0 %v3518_v45, %s3798_s3 }
 0x7c3   :  { %3529 = vtanh.f32 %v4266_v9 }
 0x7c4   :  { %v3520_v34 = vpop.eup %3519 }
 0x7c5   :  { %v3522_v1 = vpop.eup %3521  ;;  %1141 = vrot.lane.b32.xlu1 %v3520_v34, %s3798_s3 }
 0x7c6   :  { %1145 = vrot.lane.b32.xlu0 %v3522_v1, %s3798_s3 }
 0x7c8   :  { %v3524_v33 = vpop.eup %3523 }
 0x7c9   :  { %v3526_v48 = vpop.eup %3525  ;;  %1149 = vrot.lane.b32.xlu1 %v3524_v33, %s3798_s3 }
 0x7ca   :  { %1147 = vrot.lane.b32.xlu0 %v3526_v48, %s3798_s3 }
 0x7cc   :  { %v3528_v28 = vpop.eup %3527 }
 0x7cd   :  { %v3530_v50 = vpop.eup %3529  ;;  %1153 = vrot.lane.b32.xlu1 %v3528_v28, %s3798_s3 }
 0x7ce   :  { %1151 = vrot.lane.b32.xlu0 %v3530_v50, %s3798_s3 }
 0x833   :  { %v1144_v36 = vpop.permute.xlu1 %1143 }
 0x834   :  { %v1140_v52 = vpop.permute.xlu0 %1139  ;;  %v1165_v51 = vmul.f32 %v4181_v58, %v1144_v36 }
 0x835   :  { %v1163_v29 = vmul.f32 %v4183_v59, %v1140_v52 }
 0x837   :  { %v1142_v54 = vpop.permute.xlu1 %1141  ;;  %v1179_v57 = vrot.slane %v1163_v29, 2 }
 0x838   :  { %v1164_v55 = vmul.f32 %v4186_v47, %v1142_v54  ;;  %v1146_v56 = vpop.permute.xlu0 %1145 }
 0x839   :  { %v1166_v39 = vmul.f32 %v4189_v60, %v1146_v56 }
 0x83a   :  { %v1180_v44 = vrot.slane %v1164_v55, 1 }
 0x83b   :  { %v1150_v62 = vpop.permute.xlu1 %1149  ;;  %v1183_v42 = vrot.slane %v1166_v39, 7 }
 0x83c   :  { %v1181_v0 = vsel %vm485_vm3, %v1180_v44, %v1179_v57  ;;  %v1148_v46 = vpop.permute.xlu0 %1147  ;;  %v1168_v59 = vmul.f32 %v4195_v2, %v1150_v62 }
 0x83d   :  { %v1182_v18 = vsel %vm488_vm4, %v1165_v51, %v1181_v0  ;;  %v1167_v3 = vmul.f32 %v4192_v63, %v1148_v46 }
 0x83e   :  { %v1184_v8 = vsel %vm491_vm5, %v1183_v42, %v1182_v18  ;;  %v1187_v20 = vrot.slane %v1168_v59, 5 }
 0x83f   :  { %v1185_v31 = vrot.slane %v1167_v3, 6  ;;  %v1154_v47 = vpop.permute.xlu1 %1153 }
 0x840   :  { %v1170_v60 = vmul.f32 %v4200_v4, %v1154_v47  ;;  %v1152_v21 = vpop.permute.xlu0 %1151 }
 0x841   :  { %v1186_v58 = vsel %vm494_vm6, %v1185_v31, %v1184_v8  ;;  %v1169_v13 = vmul.f32 %v4203_v30, %v1152_v21 }
 0x842   :  { %v1191_v35 = vrot.slane %v1170_v60, 3  ;;  %v1188_v27 = vsel %vm497_vm7, %v1187_v20, %v1186_v58 }
 0x843   :  { %v1189_v14 = vrot.slane %v1169_v13, 4 }
 0x845   :  { %v1190_v63 = vsel %vm500_vm8, %v1189_v14, %v1188_v27 }
 0x846   :  { %v1192_v2 = vsel %vm503_vm9, %v1191_v35, %v1190_v63 }
 0x847   :  { %1193 = vrot.lane.b32.xlu0 %v1192_v2, %s3799_s22 }
 0x8b9   :  { %v1194_v19 = vpop.permute.xlu0 %1193 }
 0x8ba   :  { %3270 = vmatmul.mubr.msk.f32.vlgmr.msra.gmra.mrb[4].mxu1 %vm178_vm10, %v1194_v19 }
 0x8bb   :  { %3359 = vmatpush3.bf16.msra.mxu1 %v3853_v6  ;;  %3291 = vmatprep.mubr.msk.f32.mxu1 %vm3796_vm2, %v3797_v10 }
 0x8bc   :  { %3360 = vmatprep.subr.bf16.mxu1 %v3795_v5 }
 0x8bf   :  { %3362 = vmatpush3.bf16.msra.mxu1 %v3872_v12 }
 0x8c0   :  { %3369 = vmatprep.subr.bf16.mxu1 %v3795_v5 }
 0x98d   :  { %v1263_v4 = vpop.f32.mrb[4].mxu1 }
 0x98e   :  { %v1268_v30 = vrot.slane %v1263_v4, 5  ;;  %v1269_v32 = vrot.slane %v1263_v4, 6  ;;  %v1270_v37 = vrot.slane %v1263_v4, 7  ;;  %v1271_v40 = vrot.slane %v1263_v4, 1  ;;  %v3271_v43 = vpop.f32.mrb[5].mxu1 }
 0x98f   :  { %v1272_v45 = vrot.slane %v1263_v4, 2  ;;  %v1273_v34 = vrot.slane %v1263_v4, 3  ;;  %v1274_v1 = vrot.slane %v1263_v4, 4  ;;  %v1286_v33 = vadd.f32 %v1263_v4, %v3915_v24 }
 0x990   :  { %v1283_v48 = vadd.f32 %v1268_v30, %v3911_v22  ;;  %v1284_v28 = vadd.f32 %v1269_v32, %v3913_v23  ;;  %v1285_v50 = vadd.f32 %v1270_v37, %v3917_v25  ;;  %v1287_v36 = vadd.f32 %v1271_v40, %v3925_v41 }
 0x991   :  { %v1288_v52 = vadd.f32 %v1272_v45, %v3923_v38  ;;  %v1289_v29 = vadd.f32 %v1273_v34, %v3931_v53  ;;  %v3077_v54 = vmul.f32 -1.442695, %v1286_v33  ;;  %v1290_v55 = vadd.f32 %v1274_v1, %v3929_v49 }
 0x992   :  { %v3074_v56 = vmul.f32 -1.442695, %v1283_v48  ;;  %v3075_v39 = vmul.f32 -1.442695, %v1284_v28  ;;  %v3076_v57 = vmul.f32 -1.442695, %v1285_v50 }
 0x993   :  { %3531 = vpow2.f32 %v3077_v54  ;;  %v3078_v44 = vmul.f32 -1.442695, %v1287_v36  ;;  %v3079_v51 = vmul.f32 -1.442695, %v1288_v52  ;;  %v3080_v62 = vmul.f32 -1.442695, %v1289_v29 }
 0x994   :  { %3533 = vpow2.f32 %v3074_v56  ;;  %v3081_v0 = vmul.f32 -1.442695, %v1290_v55 }
 0x995   :  { %3535 = vpow2.f32 %v3075_v39 }
 0x996   :  { %3537 = vpow2.f32 %v3076_v57 }
 0x997   :  { %3539 = vpow2.f32 %v3078_v44 }
 0x998   :  { %3541 = vpow2.f32 %v3079_v51 }
 0x999   :  { %3543 = vpow2.f32 %v3080_v62 }
 0x99a   :  { %3545 = vpow2.f32 %v3081_v0 }
 0x99d   :  { %v3532_v42 = vpop.eup %3531 }
 0x99e   :  { %v3534_v46 = vpop.eup %3533  ;;  %v1318_v18 = vadd.f32 1.0, %v3532_v42 }
 0x99f   :  { %v3536_v3 = vpop.eup %3535  ;;  %v1315_v59 = vadd.f32 1.0, %v3534_v46 }
 0x9a0   :  { %v3538_v31 = vpop.eup %3537  ;;  %v1316_v47 = vadd.f32 1.0, %v3536_v3  ;;  %3547 = vrcp.f32 %v1318_v18 }
 0x9a1   :  { %v3540_v8 = vpop.eup %3539  ;;  %v1317_v60 = vadd.f32 1.0, %v3538_v31  ;;  %3549 = vrcp.f32 %v1315_v59 }
 0x9a2   :  { %v3542_v21 = vpop.eup %3541  ;;  %v1319_v58 = vadd.f32 1.0, %v3540_v8  ;;  %3551 = vrcp.f32 %v1316_v47 }
 0x9a3   :  { %v3544_v13 = vpop.eup %3543  ;;  %v1320_v20 = vadd.f32 1.0, %v3542_v21  ;;  %3553 = vrcp.f32 %v1317_v60 }
 0x9a4   :  { %v3546_v14 = vpop.eup %3545  ;;  %v1321_v35 = vadd.f32 1.0, %v3544_v13  ;;  %3555 = vrcp.f32 %v1319_v58 }
 0x9a5   :  { %v1322_v27 = vadd.f32 1.0, %v3546_v14  ;;  %3557 = vrcp.f32 %v1320_v20  ;;  %v1366_v20 = vrot.slane %v4247_v11, 7  ;;  %v1364_v14 = vrot.slane %v4244_v15, 7 }
 0x9a6   :  { %3559 = vrcp.f32 %v1321_v35  ;;  %v1365_v15 = vrot.slane %v4234_v61, 7 }
 0x9a7   :  { %3561 = vrcp.f32 %v1322_v27 }
 0x9aa   :  { %v4308_v63 = vpop.eup %3547 }
 0x9ab   :  { %v4310_v2 = vpop.eup %3549  ;;  %v1342_v19 = vmul.f32 2.0, %v4308_v63  ;;  %v1382_v35 = vmul.f32 %v4308_v63, %v1366_v20 }
 0x9ac   :  { %v4313_v4 = vpop.eup %3551  ;;  %v1339_v40 = vmul.f32 2.0, %v4310_v2 }
 0x9ad   :  { %v4315_v30 = vpop.eup %3553  ;;  %v3085_v32 = vadd.f32 -1.0, %v1342_v19  ;;  %v1340_v37 = vmul.f32 2.0, %v4313_v4  ;;  %v1363_v19 = vrot.slane %v4237_v16, 7 }
 0x9ae   :  { %v4319_v43 = vpop.eup %3555  ;;  %v3082_v33 = vadd.f32 -1.0, %v1339_v40  ;;  %v1341_v48 = vmul.f32 2.0, %v4315_v30 }
 0x9af   :  { %1401 = vrot.lane.b32.xlu1 %v3085_v32, %s3798_s3  ;;  %v3083_v45 = vadd.f32 -1.0, %v1340_v37  ;;  %v1343_v34 = vmul.f32 2.0, %v4319_v43  ;;  %v4323_v1 = vpop.eup %3557  ;;  %v1380_v37 = vmul.f32 %v4313_v4, %v1364_v14  ;;  %v1379_v11 = vmul.f32 %v4310_v2, %v1363_v19 }
 0x9b0   :  { %v4327_v28 = vpop.eup %3559  ;;  %v1344_v36 = vmul.f32 2.0, %v4323_v1  ;;  %v3084_v29 = vadd.f32 -1.0, %v1341_v48 }
 0x9b1   :  { %1397 = vrot.lane.b32.xlu0 %v3083_v45, %s3798_s3  ;;  %v3086_v50 = vadd.f32 -1.0, %v1343_v34  ;;  %v4331_v52 = vpop.eup %3561  ;;  %v1345_v54 = vmul.f32 2.0, %v4327_v28  ;;  %v1367_v45 = vrot.slane %v4257_v26, 7 }
 0x9b2   :  { %v3087_v55 = vadd.f32 -1.0, %v1344_v36  ;;  %v1346_v56 = vmul.f32 2.0, %v4331_v52  ;;  %v1368_v36 = vrot.slane %v4254_v17, 7 }
 0x9b3   :  { %1395 = vrot.lane.b32.xlu1 %v3082_v33, %s3798_s3  ;;  %v3088_v39 = vadd.f32 -1.0, %v1345_v54  ;;  %v1383_v16 = vmul.f32 %v4319_v43, %v1367_v45 }
 0x9b4   :  { %v3089_v57 = vadd.f32 -1.0, %v1346_v56  ;;  %v1384_v56 = vmul.f32 %v4323_v1, %v1368_v36 }
 0x9b5   :  { %1403 = vrot.lane.b32.xlu0 %v3086_v50, %s3798_s3 }
 0x9b7   :  { %1399 = vrot.lane.b32.xlu1 %v3084_v29, %s3798_s3  ;;  %v1381_v29 = vmul.f32 %v4315_v30, %v1365_v15 }
 0x9b9   :  { %1405 = vrot.lane.b32.xlu0 %v3087_v55, %s3798_s3  ;;  %v1369_v55 = vrot.slane %v4266_v9, 7 }
 0x9bb   :  { %1407 = vrot.lane.b32.xlu1 %v3088_v39, %s3798_s3 }
 0x9bd   :  { %1409 = vrot.lane.b32.xlu0 %v3089_v57, %s3798_s3  ;;  %v1370_v57 = vrot.slane %v4263_v7, 7 }
 0xa21   :  { %v1402_v44 = vpop.permute.xlu1 %1401 }
 0xa22   :  { %v1422_v51 = vmul.f32 %v4308_v63, %v1402_v44  ;;  %v1385_v44 = vmul.f32 %v4327_v28, %v1369_v55 }
 0xa23   :  { %v1398_v62 = vpop.permute.xlu0 %1397 }
 0xa24   :  { %v1420_v0 = vmul.f32 %v4313_v4, %v1398_v62  ;;  %1441 = vrot.lane.b32.xlu1 %v1422_v51, %s3798_s3 }
 0xa25   :  { %v1396_v42 = vpop.permute.xlu1 %1395 }
 0xa26   :  { %v1419_v46 = vmul.f32 %v4310_v2, %v1396_v42  ;;  %1437 = vrot.lane.b32.xlu0 %v1420_v0, %s3798_s3  ;;  %v1386_v0 = vmul.f32 %v4331_v52, %v1370_v57 }
 0xa27   :  { %v1404_v18 = vpop.permute.xlu0 %1403 }
 0xa28   :  { %v1423_v3 = vmul.f32 %v4319_v43, %v1404_v18  ;;  %1435 = vrot.lane.b32.xlu1 %v1419_v46, %s3798_s3 }
 0xa29   :  { %v1400_v59 = vpop.permute.xlu1 %1399 }
 0xa2a   :  { %v1421_v31 = vmul.f32 %v4315_v30, %v1400_v59  ;;  %1443 = vrot.lane.b32.xlu0 %v1423_v3, %s3798_s3 }
 0xa2b   :  { %v1406_v47 = vpop.permute.xlu0 %1405 }
 0xa2c   :  { %v1424_v8 = vmul.f32 %v4323_v1, %v1406_v47  ;;  %1439 = vrot.lane.b32.xlu1 %v1421_v31, %s3798_s3 }
 0xa2d   :  { %v1408_v60 = vpop.permute.xlu1 %1407 }
 0xa2e   :  { %v1425_v21 = vmul.f32 %v4327_v28, %v1408_v60  ;;  %1445 = vrot.lane.b32.xlu0 %v1424_v8, %s3798_s3 }
 0xa2f   :  { %v1410_v58 = vpop.permute.xlu0 %1409 }
 0xa30   :  { %v1426_v13 = vmul.f32 %v4331_v52, %v1410_v58  ;;  %1447 = vrot.lane.b32.xlu1 %v1425_v21, %s3798_s3 }
 0xa32   :  { %1449 = vrot.lane.b32.xlu0 %v1426_v13, %s3798_s3 }
 0xa96   :  { %v1442_v27 = vpop.permute.xlu1 %1441 }
 0xa97   :  { %v4360_v32 = vadd.f32 %v1442_v27, %v1382_v35 }
 0xa98   :  { %v1438_v40 = vpop.permute.xlu0 %1437 }
 0xa99   :  { %3563 = vtanh.f32 %v4360_v32  ;;  %v4365_v34 = vadd.f32 %v1438_v40, %v1380_v37 }
 0xa9a   :  { %v1436_v33 = vpop.permute.xlu1 %1435 }
 0xa9b   :  { %3565 = vtanh.f32 %v4365_v34  ;;  %v4370_v48 = vadd.f32 %v1436_v33, %v1379_v11 }
 0xa9c   :  { %v1444_v50 = vpop.permute.xlu0 %1443 }
 0xa9d   :  { %3567 = vtanh.f32 %v4370_v48  ;;  %v4375_v26 = vadd.f32 %v1444_v50, %v1383_v16 }
 0xa9e   :  { %v1440_v54 = vpop.permute.xlu1 %1439 }
 0xa9f   :  { %3569 = vtanh.f32 %v4375_v26  ;;  %v4380_v61 = vadd.f32 %v1440_v54, %v1381_v29 }
 0xaa0   :  { %v1446_v39 = vpop.permute.xlu0 %1445 }
 0xaa1   :  { %3571 = vtanh.f32 %v4380_v61  ;;  %v4385_v17 = vadd.f32 %v1446_v39, %v1384_v56 }
 0xaa2   :  { %v1448_v51 = vpop.permute.xlu1 %1447 }
 0xaa3   :  { %v3564_v62 = vpop.eup %3563  ;;  %3573 = vtanh.f32 %v4385_v17  ;;  %v4389_v9 = vadd.f32 %v1448_v51, %v1385_v44 }
 0xaa4   :  { %v1450_v42 = vpop.permute.xlu0 %1449  ;;  %1489 = vrot.lane.b32.xlu1 %v3564_v62, %s3798_s3 }
 0xaa5   :  { %v3566_v46 = vpop.eup %3565  ;;  %3575 = vtanh.f32 %v4389_v9  ;;  %v4394_v7 = vadd.f32 %v1450_v42, %v1386_v0 }
 0xaa6   :  { %1485 = vrot.lane.b32.xlu0 %v3566_v46, %s3798_s3 }
 0xaa7   :  { %v3568_v18 = vpop.eup %3567  ;;  %3577 = vtanh.f32 %v4394_v7 }
 0xaa8   :  { %1483 = vrot.lane.b32.xlu1 %v3568_v18, %s3798_s3 }
 0xaa9   :  { %v3570_v3 = vpop.eup %3569 }
 0xaaa   :  { %1491 = vrot.lane.b32.xlu0 %v3570_v3, %s3798_s3 }
 0xaab   :  { %v3572_v59 = vpop.eup %3571 }
 0xaac   :  { %1487 = vrot.lane.b32.xlu1 %v3572_v59, %s3798_s3 }
 0xaad   :  { %v3574_v31 = vpop.eup %3573 }
 0xaae   :  { %1493 = vrot.lane.b32.xlu0 %v3574_v31, %s3798_s3 }
 0xaaf   :  { %v3576_v47 = vpop.eup %3575 }
 0xab0   :  { %1495 = vrot.lane.b32.xlu1 %v3576_v47, %s3798_s3 }
 0xab1   :  { %v3578_v8 = vpop.eup %3577 }
 0xab2   :  { %1497 = vrot.lane.b32.xlu0 %v3578_v8, %s3798_s3 }
 0xb16   :  { %v1490_v60 = vpop.permute.xlu1 %1489 }
 0xb17   :  { %v1510_v15 = vmul.f32 %v4308_v63, %v1490_v60 }
 0xb18   :  { %v1486_v21 = vpop.permute.xlu0 %1485 }
 0xb19   :  { %v1508_v20 = vmul.f32 %v4313_v4, %v1486_v21 }
 0xb1a   :  { %v1484_v58 = vpop.permute.xlu1 %1483 }
 0xb1b   :  { %v1507_v13 = vmul.f32 %v4310_v2, %v1484_v58  ;;  %v1524_v40 = vrot.slane %v1508_v20, 2 }
 0xb1c   :  { %v1492_v14 = vpop.permute.xlu0 %1491 }
 0xb1d   :  { %v1523_v35 = vrot.slane %v1507_v13, 3  ;;  %v1511_v19 = vmul.f32 %v4319_v43, %v1492_v14 }
 0xb1e   :  { %v1488_v27 = vpop.permute.xlu1 %1487 }
 0xb1f   :  { %v1509_v37 = vmul.f32 %v4315_v30, %v1488_v27  ;;  %v1525_v16 = vsel %vm485_vm3, %v1524_v40, %v1523_v35  ;;  %v1529_v2 = vrot.slane %v1511_v19, 7 }
 0xb20   :  { %v1494_v45 = vpop.permute.xlu0 %1493 }
 0xb21   :  { %v1526_v11 = vrot.slane %v1509_v37, 1  ;;  %v1512_v33 = vmul.f32 %v4323_v1, %v1494_v45 }
 0xb22   :  { %v1496_v50 = vpop.permute.xlu1 %1495 }
 0xb23   :  { %v1527_v4 = vsel %vm488_vm4, %v1526_v11, %v1525_v16  ;;  %v1531_v36 = vrot.slane %v1512_v33, 6  ;;  %v1513_v29 = vmul.f32 %v4327_v28, %v1496_v50 }
 0xb24   :  { %v1528_v43 = vsel %vm491_vm5, %v1510_v15, %v1527_v4  ;;  %v1498_v54 = vpop.permute.xlu0 %1497 }
 0xb25   :  { %v1530_v30 = vsel %vm494_vm6, %v1529_v2, %v1528_v43  ;;  %v1533_v55 = vrot.slane %v1513_v29, 5  ;;  %v1514_v56 = vmul.f32 %v4331_v52, %v1498_v54 }
 0xb26   :  { %v1532_v1 = vsel %vm497_vm7, %v1531_v36, %v1530_v30 }
 0xb27   :  { %v1535_v63 = vrot.slane %v1514_v56, 4  ;;  %v1534_v39 = vsel %vm500_vm8, %v1533_v55, %v1532_v1 }
 0xb29   :  { %v1536_v57 = vsel %vm503_vm9, %v1535_v63, %v1534_v39 }
 0xb2a   :  { %1537 = vrot.lane.b32.xlu1 %v1536_v57, %s3799_s22 }
 0xb9c   :  { %v1538_v44 = vpop.permute.xlu1 %1537 }
 0xb9d   :  { %3281 = vmatmul.mubr.msk.f32.vlgmr.msra.gmra.mrb[10].mxu0 %vm178_vm10, %v1538_v44 }
 0xb9e   :  { %3365 = vmatpush3.bf16.msra.mxu0 %v3853_v6  ;;  %3302 = vmatprep.mubr.msk.f32.mxu0 %vm3796_vm2, %v3797_v10 }
 0xb9f   :  { %3366 = vmatprep.subr.bf16.mxu0 %v3795_v5 }
 0xba2   :  { %3368 = vmatpush3.bf16.msra.mxu0 %v3872_v12 }
 0xba3   :  { %3375 = vmatprep.subr.bf16.mxu0 %v3795_v5 }
 0xc70   :  { %v1607_v28 = vpop.f32.mrb[10].mxu0 }
 0xc71   :  { %v1612_v52 = vrot.slane %v1607_v28, 4  ;;  %v1613_v51 = vrot.slane %v1607_v28, 5  ;;  %v1614_v62 = vrot.slane %v1607_v28, 6  ;;  %v1615_v0 = vrot.slane %v1607_v28, 7  ;;  %v3282_v42 = vpop.f32.mrb[11].mxu0 }
 0xc72   :  { %v1616_v46 = vrot.slane %v1607_v28, 1  ;;  %v1617_v18 = vrot.slane %v1607_v28, 2  ;;  %v1618_v3 = vrot.slane %v1607_v28, 3  ;;  %v1631_v59 = vadd.f32 %v1607_v28, %v3925_v41 }
 0xc73   :  { %v1627_v31 = vadd.f32 %v1612_v52, %v3911_v22  ;;  %v1628_v47 = vadd.f32 %v1613_v51, %v3913_v23  ;;  %v1629_v8 = vadd.f32 %v1614_v62, %v3917_v25  ;;  %v1630_v60 = vadd.f32 %v1615_v0, %v3915_v24 }
 0xc74   :  { %v1632_v21 = vadd.f32 %v1616_v46, %v3923_v38  ;;  %v1633_v58 = vadd.f32 %v1617_v18, %v3931_v53  ;;  %v3095_v13 = vmul.f32 -1.442695, %v1631_v59  ;;  %v1634_v20 = vadd.f32 %v1618_v3, %v3929_v49 }
 0xc75   :  { %v3091_v14 = vmul.f32 -1.442695, %v1627_v31  ;;  %v3092_v35 = vmul.f32 -1.442695, %v1628_v47  ;;  %v3093_v27 = vmul.f32 -1.442695, %v1629_v8 }
 0xc76   :  { %v3094_v19 = vmul.f32 -1.442695, %v1630_v60  ;;  %3579 = vpow2.f32 %v3095_v13  ;;  %v3096_v37 = vmul.f32 -1.442695, %v1632_v21  ;;  %v3097_v40 = vmul.f32 -1.442695, %v1633_v58 }
 0xc77   :  { %3581 = vpow2.f32 %v3091_v14  ;;  %v3098_v45 = vmul.f32 -1.442695, %v1634_v20 }
 0xc78   :  { %3583 = vpow2.f32 %v3092_v35 }
 0xc79   :  { %3585 = vpow2.f32 %v3093_v27 }
 0xc7a   :  { %3587 = vpow2.f32 %v3094_v19 }
 0xc7b   :  { %3589 = vpow2.f32 %v3096_v37 }
 0xc7c   :  { %3591 = vpow2.f32 %v3097_v40 }
 0xc7d   :  { %3593 = vpow2.f32 %v3098_v45 }
 0xc80   :  { %v3580_v11 = vpop.eup %3579 }
 0xc81   :  { %v3582_v33 = vpop.eup %3581  ;;  %v1663_v15 = vadd.f32 1.0, %v3580_v11 }
 0xc82   :  { %v3584_v16 = vpop.eup %3583  ;;  %v1659_v50 = vadd.f32 1.0, %v3582_v33 }
 0xc83   :  { %v3586_v2 = vpop.eup %3585  ;;  %v1660_v4 = vadd.f32 1.0, %v3584_v16  ;;  %3595 = vrcp.f32 %v1663_v15 }
 0xc84   :  { %v3588_v36 = vpop.eup %3587  ;;  %v1661_v29 = vadd.f32 1.0, %v3586_v2  ;;  %3597 = vrcp.f32 %v1659_v50 }
 0xc85   :  { %v3590_v43 = vpop.eup %3589  ;;  %v1662_v54 = vadd.f32 1.0, %v3588_v36  ;;  %3599 = vrcp.f32 %v1660_v4 }
 0xc86   :  { %v3592_v30 = vpop.eup %3591  ;;  %v1664_v55 = vadd.f32 1.0, %v3590_v43  ;;  %3601 = vrcp.f32 %v1661_v29 }
 0xc87   :  { %v3594_v56 = vpop.eup %3593  ;;  %3603 = vrcp.f32 %v1662_v54  ;;  %v1665_v1 = vadd.f32 1.0, %v3592_v30 }
 0xc88   :  { %v1666_v63 = vadd.f32 1.0, %v3594_v56  ;;  %3605 = vrcp.f32 %v1664_v55  ;;  %v1711_v55 = vrot.slane %v4375_v26, 7  ;;  %v1707_v56 = vrot.slane %v4370_v48, 7 }
 0xc8a   :  { %3607 = vrcp.f32 %v1666_v63 }
 0xc8b   :  { %3609 = vrcp.f32 %v1665_v1 }
 0xc8d   :  { %v4435_v39 = vpop.eup %3595 }
 0xc8e   :  { %v4437_v57 = vpop.eup %3597  ;;  %v1687_v44 = vmul.f32 2.0, %v4435_v39  ;;  %v1727_v1 = vmul.f32 %v4435_v39, %v1711_v55 }
 0xc8f   :  { %v4440_v28 = vpop.eup %3599  ;;  %v1683_v52 = vmul.f32 2.0, %v4437_v57 }
 0xc90   :  { %v4443_v51 = vpop.eup %3601  ;;  %v3103_v62 = vadd.f32 -1.0, %v1687_v44  ;;  %v1684_v0 = vmul.f32 2.0, %v4440_v28  ;;  %v1723_v44 = vmul.f32 %v4437_v57, %v1707_v56 }
 0xc91   :  { %v4446_v42 = vpop.eup %3603  ;;  %v3099_v46 = vadd.f32 -1.0, %v1683_v52  ;;  %v1685_v18 = vmul.f32 2.0, %v4443_v51  ;;  %v1708_v52 = vrot.slane %v4365_v34, 7 }
 0xc92   :  { %v4449_v3 = vpop.eup %3605  ;;  %1747 = vrot.lane.b32.xlu1 %v3103_v62, %s3798_s3  ;;  %v3100_v59 = vadd.f32 -1.0, %v1684_v0  ;;  %v1686_v31 = vmul.f32 2.0, %v4446_v42 }
 0xc93   :  { %1739 = vrot.lane.b32.xlu0 %v3099_v46, %s3798_s3  ;;  %v3101_v8 = vadd.f32 -1.0, %v1685_v18  ;;  %v1688_v60 = vmul.f32 2.0, %v4449_v3  ;;  %v1709_v46 = vrot.slane %v4380_v61, 7  ;;  %v1724_v26 = vmul.f32 %v4440_v28, %v1708_v52 }
 0xc94   :  { %v4454_v47 = vpop.eup %3607  ;;  %v3102_v58 = vadd.f32 -1.0, %v1686_v31  ;;  %v1710_v31 = vrot.slane %v4360_v32, 7 }
 0xc95   :  { %v4457_v21 = vpop.eup %3609  ;;  %v1690_v13 = vmul.f32 2.0, %v4454_v47  ;;  %v3104_v20 = vadd.f32 -1.0, %v1688_v60  ;;  %v1712_v60 = vrot.slane %v4385_v17, 7 }
 0xc96   :  { %1741 = vrot.lane.b32.xlu1 %v3100_v59, %s3798_s3  ;;  %v1689_v14 = vmul.f32 2.0, %v4457_v21  ;;  %v1725_v59 = vmul.f32 %v4443_v51, %v1709_v46  ;;  %v1726_v61 = vmul.f32 %v4446_v42, %v1710_v31 }
 0xc97   :  { %1743 = vrot.lane.b32.xlu0 %v3101_v8, %s3798_s3  ;;  %v3106_v35 = vadd.f32 -1.0, %v1690_v13 }
 0xc98   :  { %v3105_v27 = vadd.f32 -1.0, %v1689_v14  ;;  %v1714_v14 = vrot.slane %v4394_v7, 7 }
 0xc9a   :  { %1745 = vrot.lane.b32.xlu1 %v3102_v58, %s3798_s3  ;;  %v1730_v17 = vmul.f32 %v4454_v47, %v1714_v14 }
 0xc9b   :  { %1749 = vrot.lane.b32.xlu0 %v3104_v20, %s3798_s3  ;;  %v1728_v20 = vmul.f32 %v4449_v3, %v1712_v60 }
 0xc9e   :  { %1753 = vrot.lane.b32.xlu1 %v3106_v35, %s3798_s3 }
 0xc9f   :  { %1751 = vrot.lane.b32.xlu0 %v3105_v27, %s3798_s3  ;;  %v1713_v27 = vrot.slane %v4389_v9, 7 }
 0xd04   :  { %v1748_v19 = vpop.permute.xlu1 %1747 }
 0xd05   :  { %v1767_v37 = vmul.f32 %v4435_v39, %v1748_v19  ;;  %v1740_v40 = vpop.permute.xlu0 %1739 }
 0xd06   :  { %v1763_v45 = vmul.f32 %v4437_v57, %v1740_v40  ;;  %v1729_v40 = vmul.f32 %v4457_v21, %v1713_v27 }
 0xd07   :  { %1787 = vrot.lane.b32.xlu1 %v1767_v37, %s3798_s3 }
 0xd08   :  { %v1742_v11 = vpop.permute.xlu1 %1741  ;;  %1779 = vrot.lane.b32.xlu0 %v1763_v45, %s3798_s3 }
 0xd09   :  { %v1764_v33 = vmul.f32 %v4440_v28, %v1742_v11  ;;  %v1744_v15 = vpop.permute.xlu0 %1743 }
 0xd0a   :  { %v1765_v16 = vmul.f32 %v4443_v51, %v1744_v15 }
 0xd0b   :  { %1781 = vrot.lane.b32.xlu1 %v1764_v33, %s3798_s3 }
 0xd0c   :  { %v1746_v50 = vpop.permute.xlu1 %1745  ;;  %1783 = vrot.lane.b32.xlu0 %v1765_v16, %s3798_s3 }
 0xd0d   :  { %v1766_v2 = vmul.f32 %v4446_v42, %v1746_v50  ;;  %v1750_v4 = vpop.permute.xlu0 %1749 }
 0xd0e   :  { %v1768_v36 = vmul.f32 %v4449_v3, %v1750_v4 }
 0xd0f   :  { %1785 = vrot.lane.b32.xlu1 %v1766_v2, %s3798_s3 }
 0xd10   :  { %v1754_v29 = vpop.permute.xlu1 %1753  ;;  %1789 = vrot.lane.b32.xlu0 %v1768_v36, %s3798_s3 }
 0xd11   :  { %v1770_v43 = vmul.f32 %v4454_v47, %v1754_v29  ;;  %v1752_v54 = vpop.permute.xlu0 %1751 }
 0xd12   :  { %v1769_v30 = vmul.f32 %v4457_v21, %v1752_v54 }
 0xd13   :  { %1793 = vrot.lane.b32.xlu1 %v1770_v43, %s3798_s3 }
 0xd14   :  { %1791 = vrot.lane.b32.xlu0 %v1769_v30, %s3798_s3 }
 0xd79   :  { %v1788_v63 = vpop.permute.xlu1 %1787 }
 0xd7a   :  { %v4488_v62 = vadd.f32 %v1788_v63, %v1727_v1  ;;  %v1780_v0 = vpop.permute.xlu0 %1779 }
 0xd7b   :  { %v4491_v18 = vadd.f32 %v1780_v0, %v1723_v44 }
 0xd7c   :  { %3611 = vtanh.f32 %v4488_v62 }
 0xd7d   :  { %3613 = vtanh.f32 %v4491_v18  ;;  %v1782_v48 = vpop.permute.xlu1 %1781 }
 0xd7e   :  { %v4498_v8 = vadd.f32 %v1782_v48, %v1724_v26  ;;  %v1784_v34 = vpop.permute.xlu0 %1783 }
 0xd7f   :  { %v4501_v58 = vadd.f32 %v1784_v34, %v1725_v59 }
 0xd80   :  { %3615 = vtanh.f32 %v4498_v8 }
 0xd81   :  { %3617 = vtanh.f32 %v4501_v58  ;;  %v1786_v13 = vpop.permute.xlu1 %1785 }
 0xd82   :  { %v4508_v35 = vadd.f32 %v1786_v13, %v1726_v61  ;;  %v1790_v32 = vpop.permute.xlu0 %1789 }
 0xd83   :  { %v4511_v19 = vadd.f32 %v1790_v32, %v1728_v20 }
 0xd84   :  { %3619 = vtanh.f32 %v4508_v35 }
 0xd85   :  { %3621 = vtanh.f32 %v4511_v19  ;;  %v1794_v37 = vpop.permute.xlu1 %1793 }
 0xd86   :  { %v3612_v45 = vpop.eup %3611  ;;  %v4517_v11 = vadd.f32 %v1794_v37, %v1730_v17  ;;  %v1792_v7 = vpop.permute.xlu0 %1791 }
 0xd87   :  { %v3614_v33 = vpop.eup %3613  ;;  %1835 = vrot.lane.b32.xlu1 %v3612_v45, %s3798_s3  ;;  %v4520_v15 = vadd.f32 %v1792_v7, %v1729_v40 }
 0xd88   :  { %3623 = vtanh.f32 %v4517_v11  ;;  %1827 = vrot.lane.b32.xlu0 %v3614_v33, %s3798_s3 }
 0xd89   :  { %3625 = vtanh.f32 %v4520_v15 }
 0xd8a   :  { %v3616_v9 = vpop.eup %3615 }
 0xd8b   :  { %v3618_v16 = vpop.eup %3617  ;;  %1829 = vrot.lane.b32.xlu1 %v3616_v9, %s3798_s3 }
 0xd8c   :  { %1831 = vrot.lane.b32.xlu0 %v3618_v16, %s3798_s3 }
 0xd8e   :  { %v3620_v50 = vpop.eup %3619 }
 0xd8f   :  { %v3622_v2 = vpop.eup %3621  ;;  %1833 = vrot.lane.b32.xlu1 %v3620_v50, %s3798_s3 }
 0xd90   :  { %1837 = vrot.lane.b32.xlu0 %v3622_v2, %s3798_s3 }
 0xd92   :  { %v3624_v4 = vpop.eup %3623 }
 0xd93   :  { %v3626_v36 = vpop.eup %3625  ;;  %1841 = vrot.lane.b32.xlu1 %v3624_v4, %s3798_s3 }
 0xd94   :  { %1839 = vrot.lane.b32.xlu0 %v3626_v36, %s3798_s3 }
 0xdf9   :  { %v1836_v29 = vpop.permute.xlu1 %1835 }
 0xdfa   :  { %v1828_v43 = vpop.permute.xlu0 %1827  ;;  %v1855_v34 = vmul.f32 %v4435_v39, %v1836_v29 }
 0xdfb   :  { %v1851_v54 = vmul.f32 %v4437_v57, %v1828_v43 }
 0xdfd   :  { %v1830_v30 = vpop.permute.xlu1 %1829  ;;  %v1867_v63 = vrot.slane %v1851_v54, 4 }
 0xdfe   :  { %v1852_v55 = vmul.f32 %v4440_v28, %v1830_v30  ;;  %v1832_v56 = vpop.permute.xlu0 %1831 }
 0xdff   :  { %v1853_v1 = vmul.f32 %v4443_v51, %v1832_v56 }
 0xe00   :  { %v1868_v44 = vrot.slane %v1852_v55, 3 }
 0xe01   :  { %v1870_v52 = vrot.slane %v1853_v1, 2  ;;  %v1834_v0 = vpop.permute.xlu1 %1833 }
 0xe02   :  { %v1869_v46 = vsel %vm485_vm3, %v1868_v44, %v1867_v63  ;;  %v1854_v26 = vmul.f32 %v4446_v42, %v1834_v0  ;;  %v1838_v48 = vpop.permute.xlu0 %1837 }
 0xe03   :  { %v1871_v59 = vsel %vm488_vm4, %v1870_v52, %v1869_v46  ;;  %v1856_v31 = vmul.f32 %v4449_v3, %v1838_v48 }
 0xe04   :  { %v1872_v57 = vrot.slane %v1854_v26, 1 }
 0xe05   :  { %v1842_v28 = vpop.permute.xlu1 %1841  ;;  %v1875_v51 = vrot.slane %v1856_v31, 7 }
 0xe06   :  { %v1873_v60 = vsel %vm491_vm5, %v1872_v57, %v1871_v59  ;;  %v1858_v61 = vmul.f32 %v4454_v47, %v1842_v28  ;;  %v1840_v13 = vpop.permute.xlu0 %1839 }
 0xe07   :  { %v1874_v20 = vsel %vm494_vm6, %v1855_v34, %v1873_v60  ;;  %v1857_v14 = vmul.f32 %v4457_v21, %v1840_v13 }
 0xe08   :  { %v1876_v32 = vsel %vm497_vm7, %v1875_v51, %v1874_v20  ;;  %v1879_v27 = vrot.slane %v1858_v61, 5 }
 0xe09   :  { %v1877_v42 = vrot.slane %v1857_v14, 6 }
 0xe0b   :  { %v1878_v3 = vsel %vm500_vm8, %v1877_v42, %v1876_v32 }
 0xe0c   :  { %v1880_v17 = vsel %vm503_vm9, %v1879_v27, %v1878_v3 }
 0xe0d   :  { %1881 = vrot.lane.b32.xlu0 %v1880_v17, %s3799_s22 }
 0xe7f   :  { %v1882_v39 = vpop.permute.xlu0 %1881 }
 0xe80   :  { %3292 = vmatmul.mubr.msk.f32.vlgmr.msra.gmra.mrb[6].mxu1 %vm178_vm10, %v1882_v39 }
 0xe81   :  { %3371 = vmatpush3.bf16.msra.mxu1 %v3853_v6  ;;  %3313 = vmatprep.mubr.msk.f32.mxu1 %vm3796_vm2, %v3797_v10 }
 0xe82   :  { %3372 = vmatprep.subr.bf16.mxu1 %v3795_v5 }
 0xe85   :  { %3374 = vmatpush3.bf16.msra.mxu1 %v3872_v12 }
 0xf53   :  { %v1951_v47 = vpop.f32.mrb[6].mxu1 }
 0xf54   :  { %v1956_v21 = vrot.slane %v1951_v47, 3  ;;  %v1957_v37 = vrot.slane %v1951_v47, 4  ;;  %v1958_v40 = vrot.slane %v1951_v47, 5  ;;  %v1959_v45 = vrot.slane %v1951_v47, 6  ;;  %v3293_v7 = vpop.f32.mrb[7].mxu1 }
 0xf55   :  { %v1960_v33 = vrot.slane %v1951_v47, 7  ;;  %v1961_v9 = vrot.slane %v1951_v47, 1  ;;  %v1962_v16 = vrot.slane %v1951_v47, 2  ;;  %v1976_v50 = vadd.f32 %v1951_v47, %v3923_v38 }
 0xf56   :  { %v1971_v6 = vadd.f32 %v1956_v21, %v3911_v22  ;;  %v1972_v2 = vadd.f32 %v1957_v37, %v3913_v23  ;;  %v1973_v4 = vadd.f32 %v1958_v40, %v3917_v25  ;;  %v1974_v36 = vadd.f32 %v1959_v45, %v3915_v24 }
 0xf57   :  { %v1975_v12 = vadd.f32 %v1960_v33, %v3925_v41  ;;  %v1977_v29 = vadd.f32 %v1961_v9, %v3931_v53  ;;  %v3113_v43 = vmul.f32 -1.442695, %v1976_v50  ;;  %v1978_v54 = vadd.f32 %v1962_v16, %v3929_v49 }
 0xf58   :  { %v3108_v30 = vmul.f32 -1.442695, %v1971_v6  ;;  %v3109_v55 = vmul.f32 -1.442695, %v1972_v2  ;;  %v3110_v56 = vmul.f32 -1.442695, %v1973_v4 }
 0xf59   :  { %v3111_v1 = vmul.f32 -1.442695, %v1974_v36  ;;  %3627 = vpow2.f32 %v3113_v43  ;;  %v3112_v63 = vmul.f32 -1.442695, %v1975_v12  ;;  %v3114_v44 = vmul.f32 -1.442695, %v1977_v29 }
 0xf5a   :  { %3629 = vpow2.f32 %v3108_v30  ;;  %v3115_v52 = vmul.f32 -1.442695, %v1978_v54 }
 0xf5b   :  { %3631 = vpow2.f32 %v3109_v55 }
 0xf5c   :  { %3633 = vpow2.f32 %v3110_v56 }
 0xf5d   :  { %3635 = vpow2.f32 %v3111_v1 }
 0xf5e   :  { %3637 = vpow2.f32 %v3112_v63 }
 0xf5f   :  { %3639 = vpow2.f32 %v3114_v44 }
 0xf60   :  { %3641 = vpow2.f32 %v3115_v52 }
 0xf63   :  { %v3628_v0 = vpop.eup %3627 }
 0xf64   :  { %v3630_v46 = vpop.eup %3629  ;;  %v2008_v14 = vadd.f32 1.0, %v3628_v0 }
 0xf65   :  { %v3632_v26 = vpop.eup %3631  ;;  %v2003_v48 = vadd.f32 1.0, %v3630_v46 }
 0xf66   :  { %v3634_v59 = vpop.eup %3633  ;;  %v2004_v31 = vadd.f32 1.0, %v3632_v26 }
 0xf67   :  { %v3636_v57 = vpop.eup %3635  ;;  %v2005_v34 = vadd.f32 1.0, %v3634_v59  ;;  %3643 = vrcp.f32 %v2003_v48 }
 0xf68   :  { %v3638_v28 = vpop.eup %3637  ;;  %v2006_v60 = vadd.f32 1.0, %v3636_v57  ;;  %3645 = vrcp.f32 %v2004_v31 }
 0xf69   :  { %v3640_v51 = vpop.eup %3639  ;;  %v2007_v61 = vadd.f32 1.0, %v3638_v28  ;;  %3647 = vrcp.f32 %v2005_v34 }
 0xf6a   :  { %v3642_v13 = vpop.eup %3641  ;;  %v2009_v20 = vadd.f32 1.0, %v3640_v51  ;;  %3649 = vrcp.f32 %v2006_v60  ;;  %v2051_v51 = vrot.slane %v4491_v18, 7 }
 0xf6b   :  { %3651 = vrcp.f32 %v2007_v61  ;;  %v2010_v42 = vadd.f32 1.0, %v3642_v13  ;;  %v2052_v61 = vrot.slane %v4498_v8, 7 }
 0xf6c   :  { %3653 = vrcp.f32 %v2009_v20 }
 0xf6d   :  { %3655 = vrcp.f32 %v2008_v14 }
 0xf6e   :  { %3657 = vrcp.f32 %v2010_v42  ;;  %v2053_v42 = vrot.slane %v4501_v58, 7 }
 0xf71   :  { %v4561_v32 = vpop.eup %3643 }
 0xf72   :  { %v4563_v27 = vpop.eup %3645  ;;  %v2027_v3 = vmul.f32 2.0, %v4561_v32  ;;  %v2067_v13 = vmul.f32 %v4561_v32, %v2051_v51 }
 0xf73   :  { %v4566_v17 = vpop.eup %3647  ;;  %v2028_v39 = vmul.f32 2.0, %v4563_v27  ;;  %v2068_v20 = vmul.f32 %v4563_v27, %v2052_v61 }
 0xf74   :  { %v4569_v47 = vpop.eup %3649  ;;  %v3116_v21 = vadd.f32 -1.0, %v2027_v3  ;;  %v2029_v37 = vmul.f32 2.0, %v4566_v17  ;;  %v2069_v18 = vmul.f32 %v4566_v17, %v2053_v42 }
 0xf75   :  { %v4572_v40 = vpop.eup %3651  ;;  %v3117_v45 = vadd.f32 -1.0, %v2028_v39  ;;  %v2030_v7 = vmul.f32 2.0, %v4569_v47 }
 0xf76   :  { %v4575_v33 = vpop.eup %3653  ;;  %2083 = vrot.lane.b32.xlu1 %v3116_v21, %s3798_s3  ;;  %v3118_v9 = vadd.f32 -1.0, %v2029_v37  ;;  %v2031_v16 = vmul.f32 2.0, %v4572_v40  ;;  %v2054_v21 = vrot.slane %v4508_v35, 7 }
 0xf77   :  { %2085 = vrot.lane.b32.xlu0 %v3117_v45, %s3798_s3  ;;  %v4580_v50 = vpop.eup %3655  ;;  %v3119_v6 = vadd.f32 -1.0, %v2030_v7  ;;  %v2033_v2 = vmul.f32 2.0, %v4575_v33  ;;  %v2055_v7 = vrot.slane %v4488_v62, 7 }
 0xf78   :  { %v4583_v4 = vpop.eup %3657  ;;  %v3120_v36 = vadd.f32 -1.0, %v2031_v16  ;;  %v2032_v12 = vmul.f32 2.0, %v4580_v50  ;;  %v2070_v8 = vmul.f32 %v4569_v47, %v2054_v21  ;;  %v2057_v16 = vrot.slane %v4520_v15, 7 }
 0xf79   :  { %v3122_v29 = vadd.f32 -1.0, %v2033_v2  ;;  %v2034_v43 = vmul.f32 2.0, %v4583_v4  ;;  %v2071_v35 = vmul.f32 %v4572_v40, %v2055_v7 }
 0xf7a   :  { %2087 = vrot.lane.b32.xlu1 %v3118_v9, %s3798_s3  ;;  %v3121_v54 = vadd.f32 -1.0, %v2032_v12  ;;  %v2073_v2 = vmul.f32 %v4575_v33, %v2057_v16  ;;  %v2056_v12 = vrot.slane %v4511_v19, 7 }
 0xf7b   :  { %2089 = vrot.lane.b32.xlu0 %v3119_v6, %s3798_s3  ;;  %v3123_v30 = vadd.f32 -1.0, %v2034_v43  ;;  %v2058_v43 = vrot.slane %v4517_v11, 7 }
 0xf7c   :  { %v2072_v15 = vmul.f32 %v4580_v50, %v2056_v12 }
 0xf7e   :  { %2091 = vrot.lane.b32.xlu1 %v3120_v36, %s3798_s3 }
 0xf7f   :  { %2095 = vrot.lane.b32.xlu0 %v3122_v29, %s3798_s3 }
 0xf82   :  { %2093 = vrot.lane.b32.xlu1 %v3121_v54, %s3798_s3 }
 0xf83   :  { %2097 = vrot.lane.b32.xlu0 %v3123_v30, %s3798_s3  ;;  %v2074_v30 = vmul.f32 %v4583_v4, %v2058_v43 }
 0xfe8   :  { %v2084_v55 = vpop.permute.xlu1 %2083 }
 0xfe9   :  { %v2086_v56 = vpop.permute.xlu0 %2085  ;;  %v2107_v1 = vmul.f32 %v4561_v32, %v2084_v55 }
 0xfea   :  { %v2108_v63 = vmul.f32 %v4563_v27, %v2086_v56 }
 0xfeb   :  { %2123 = vrot.lane.b32.xlu1 %v2107_v1, %s3798_s3 }
 0xfec   :  { %2125 = vrot.lane.b32.xlu0 %v2108_v63, %s3798_s3  ;;  %v2088_v44 = vpop.permute.xlu1 %2087 }
 0xfed   :  { %v2090_v52 = vpop.permute.xlu0 %2089  ;;  %v2109_v0 = vmul.f32 %v4566_v17, %v2088_v44 }
 0xfee   :  { %v2110_v46 = vmul.f32 %v4569_v47, %v2090_v52 }
 0xfef   :  { %2127 = vrot.lane.b32.xlu1 %v2109_v0, %s3798_s3 }
 0xff0   :  { %2129 = vrot.lane.b32.xlu0 %v2110_v46, %s3798_s3  ;;  %v2092_v26 = vpop.permute.xlu1 %2091 }
 0xff1   :  { %v2096_v48 = vpop.permute.xlu0 %2095  ;;  %v2111_v59 = vmul.f32 %v4572_v40, %v2092_v26 }
 0xff2   :  { %v2113_v31 = vmul.f32 %v4575_v33, %v2096_v48 }
 0xff3   :  { %2131 = vrot.lane.b32.xlu1 %v2111_v59, %s3798_s3 }
 0xff4   :  { %2135 = vrot.lane.b32.xlu0 %v2113_v31, %s3798_s3  ;;  %v2094_v57 = vpop.permute.xlu1 %2093 }
 0xff5   :  { %v2098_v34 = vpop.permute.xlu0 %2097  ;;  %v2112_v28 = vmul.f32 %v4580_v50, %v2094_v57 }
 0xff6   :  { %v2114_v60 = vmul.f32 %v4583_v4, %v2098_v34 }
 0xff7   :  { %2133 = vrot.lane.b32.xlu1 %v2112_v28, %s3798_s3 }
 0xff8   :  { %2137 = vrot.lane.b32.xlu0 %v2114_v60, %s3798_s3 }
0x105d   :  { %v2124_v14 = vpop.permute.xlu1 %2123 }
0x105e   :  { %v2126_v3 = vpop.permute.xlu0 %2125  ;;  %v4614_v39 = vadd.f32 %v2124_v14, %v2067_v13 }
0x105f   :  { %v4617_v37 = vadd.f32 %v2126_v3, %v2068_v20 }
0x1060   :  { %3659 = vtanh.f32 %v4614_v39 }
0x1061   :  { %3661 = vtanh.f32 %v4617_v37  ;;  %v2128_v45 = vpop.permute.xlu1 %2127 }
0x1062   :  { %v2130_v9 = vpop.permute.xlu0 %2129  ;;  %v4624_v58 = vadd.f32 %v2128_v45, %v2069_v18 }
0x1063   :  { %v4627_v6 = vadd.f32 %v2130_v9, %v2070_v8 }
0x1064   :  { %3663 = vtanh.f32 %v4624_v58 }
0x1065   :  { %3665 = vtanh.f32 %v4627_v6  ;;  %v2132_v36 = vpop.permute.xlu1 %2131 }
0x1066   :  { %v2136_v29 = vpop.permute.xlu0 %2135  ;;  %v4634_v62 = vadd.f32 %v2132_v36, %v2071_v35 }
0x1067   :  { %v4637_v54 = vadd.f32 %v2136_v29, %v2073_v2 }
0x1068   :  { %3667 = vtanh.f32 %v4634_v62 }
0x1069   :  { %3669 = vtanh.f32 %v4637_v54  ;;  %v2134_v55 = vpop.permute.xlu1 %2133 }
0x106a   :  { %v3660_v56 = vpop.eup %3659  ;;  %v2138_v1 = vpop.permute.xlu0 %2137  ;;  %v4643_v63 = vadd.f32 %v2134_v55, %v2072_v15 }
0x106b   :  { %v3662_v19 = vpop.eup %3661  ;;  %v4645_v44 = vadd.f32 %v2138_v1, %v2074_v30  ;;  %2171 = vrot.lane.b32.xlu1 %v3660_v56, %s3798_s3 }
0x106c   :  { %3671 = vtanh.f32 %v4643_v63  ;;  %2173 = vrot.lane.b32.xlu0 %v3662_v19, %s3798_s3 }
0x106d   :  { %3673 = vtanh.f32 %v4645_v44 }
0x106e   :  { %v3664_v11 = vpop.eup %3663 }
0x106f   :  { %v3666_v52 = vpop.eup %3665  ;;  %2175 = vrot.lane.b32.xlu1 %v3664_v11, %s3798_s3 }
0x1070   :  { %2177 = vrot.lane.b32.xlu0 %v3666_v52, %s3798_s3 }
0x1072   :  { %v3668_v0 = vpop.eup %3667 }
0x1073   :  { %v3670_v46 = vpop.eup %3669  ;;  %2179 = vrot.lane.b32.xlu1 %v3668_v0, %s3798_s3 }
0x1074   :  { %2183 = vrot.lane.b32.xlu0 %v3670_v46, %s3798_s3 }
0x1076   :  { %v3672_v26 = vpop.eup %3671 }
0x1077   :  { %v3674_v48 = vpop.eup %3673  ;;  %2181 = vrot.lane.b32.xlu1 %v3672_v26, %s3798_s3 }
0x1078   :  { %2185 = vrot.lane.b32.xlu0 %v3674_v48, %s3798_s3 }
0x10dd   :  { %v2172_v59 = vpop.permute.xlu1 %2171 }
0x10de   :  { %v2174_v31 = vpop.permute.xlu0 %2173  ;;  %v2195_v57 = vmul.f32 %v4561_v32, %v2172_v59 }
0x10df   :  { %v2196_v34 = vmul.f32 %v4563_v27, %v2174_v31 }
0x10e0   :  { %v2211_v60 = vrot.slane %v2195_v57, 5 }
0x10e1   :  { %v2212_v28 = vrot.slane %v2196_v34, 4  ;;  %v2176_v51 = vpop.permute.xlu1 %2175 }
0x10e2   :  { %v2178_v61 = vpop.permute.xlu0 %2177  ;;  %v2197_v13 = vmul.f32 %v4566_v17, %v2176_v51 }
0x10e3   :  { %v2198_v20 = vmul.f32 %v4569_v47, %v2178_v61  ;;  %v2213_v42 = vsel %vm485_vm3, %v2212_v28, %v2211_v60 }
0x10e4   :  { %v2214_v14 = vrot.slane %v2197_v13, 3 }
0x10e5   :  { %v2216_v3 = vrot.slane %v2198_v20, 2  ;;  %v2180_v21 = vpop.permute.xlu1 %2179 }
0x10e6   :  { %v2215_v18 = vsel %vm488_vm4, %v2214_v14, %v2213_v42  ;;  %v2184_v8 = vpop.permute.xlu0 %2183  ;;  %v2199_v32 = vmul.f32 %v4572_v40, %v2180_v21 }
0x10e7   :  { %v2201_v27 = vmul.f32 %v4575_v33, %v2184_v8  ;;  %v2217_v7 = vsel %vm491_vm5, %v2216_v3, %v2215_v18 }
0x10e8   :  { %v2218_v45 = vrot.slane %v2199_v32, 1 }
0x10e9   :  { %v2182_v9 = vpop.permute.xlu1 %2181  ;;  %v2221_v35 = vrot.slane %v2201_v27, 7 }
0x10ea   :  { %v2219_v17 = vsel %vm494_vm6, %v2218_v45, %v2217_v7  ;;  %v2186_v16 = vpop.permute.xlu0 %2185  ;;  %v2200_v47 = vmul.f32 %v4580_v50, %v2182_v9 }
0x10eb   :  { %v2202_v2 = vmul.f32 %v4583_v4, %v2186_v16 }
0x10ec   :  { %v2220_v36 = vsel %vm497_vm7, %v2200_v47, %v2219_v17 }
0x10ed   :  { %v2223_v12 = vrot.slane %v2202_v2, 6  ;;  %v2222_v29 = vsel %vm500_vm8, %v2221_v35, %v2220_v36 }
0x10ef   :  { %v2224_v40 = vsel %vm503_vm9, %v2223_v12, %v2222_v29 }
0x10f0   :  { %2225 = vrot.lane.b32.xlu1 %v2224_v40, %s3799_s22 }
0x1162   :  { %v2226_v33 = vpop.permute.xlu1 %2225 }
0x1163   :  { %3303 = vmatmul.mubr.msk.f32.vlgmr.msra.gmra.mrb[12].mxu0 %vm178_vm10, %v2226_v33 }
0x1164   :  { %3324 = vmatprep.mubr.msk.f32.mxu0 %vm3796_vm2, %v3797_v10 }
0x1236   :  { %v2295_v43 = vpop.f32.mrb[12].mxu0 }
0x1237   :  { %v2300_v50 = vrot.slane %v2295_v43, 2  ;;  %v2301_v15 = vrot.slane %v2295_v43, 3  ;;  %v2302_v30 = vrot.slane %v2295_v43, 4  ;;  %v2303_v4 = vrot.slane %v2295_v43, 5  ;;  %v3304_v55 = vpop.f32.mrb[13].mxu0 }
0x1238   :  { %v2304_v56 = vrot.slane %v2295_v43, 6  ;;  %v2305_v1 = vrot.slane %v2295_v43, 7  ;;  %v2306_v19 = vrot.slane %v2295_v43, 1  ;;  %v2321_v11 = vadd.f32 %v2295_v43, %v3931_v53 }
0x1239   :  { %v2315_v52 = vadd.f32 %v2300_v50, %v3911_v22  ;;  %v2316_v0 = vadd.f32 %v2301_v15, %v3913_v23  ;;  %v2317_v46 = vadd.f32 %v2302_v30, %v3917_v25  ;;  %v2318_v26 = vadd.f32 %v2303_v4, %v3915_v24 }
0x123a   :  { %v2319_v10 = vadd.f32 %v2304_v56, %v3925_v41  ;;  %v2320_v48 = vadd.f32 %v2305_v1, %v3923_v38  ;;  %v3131_v59 = vmul.f32 -1.442695, %v2321_v11  ;;  %v2322_v31 = vadd.f32 %v2306_v19, %v3929_v49 }
0x123b   :  { %v3125_v57 = vmul.f32 -1.442695, %v2315_v52  ;;  %v3126_v34 = vmul.f32 -1.442695, %v2316_v0  ;;  %v3127_v28 = vmul.f32 -1.442695, %v2317_v46 }
0x123c   :  { %v3128_v60 = vmul.f32 -1.442695, %v2318_v26  ;;  %3675 = vpow2.f32 %v3131_v59  ;;  %v3129_v51 = vmul.f32 -1.442695, %v2319_v10  ;;  %v3130_v61 = vmul.f32 -1.442695, %v2320_v48 }
0x123d   :  { %3677 = vpow2.f32 %v3125_v57  ;;  %v3132_v13 = vmul.f32 -1.442695, %v2322_v31 }
0x123e   :  { %3679 = vpow2.f32 %v3126_v34 }
0x123f   :  { %3681 = vpow2.f32 %v3127_v28 }
0x1240   :  { %3683 = vpow2.f32 %v3128_v60 }
0x1241   :  { %3685 = vpow2.f32 %v3129_v51 }
0x1242   :  { %3687 = vpow2.f32 %v3130_v61 }
0x1243   :  { %3689 = vpow2.f32 %v3132_v13 }
0x1246   :  { %v3676_v20 = vpop.eup %3675 }
0x1247   :  { %v3678_v14 = vpop.eup %3677  ;;  %v2353_v35 = vadd.f32 1.0, %v3676_v20 }
0x1248   :  { %v3680_v42 = vpop.eup %3679  ;;  %v2347_v3 = vadd.f32 1.0, %v3678_v14 }
0x1249   :  { %v3682_v21 = vpop.eup %3681  ;;  %v2348_v18 = vadd.f32 1.0, %v3680_v42 }
0x124a   :  { %v3684_v8 = vpop.eup %3683  ;;  %v2349_v32 = vadd.f32 1.0, %v3682_v21  ;;  %3691 = vrcp.f32 %v2347_v3 }
0x124b   :  { %v3686_v27 = vpop.eup %3685  ;;  %v2350_v45 = vadd.f32 1.0, %v3684_v8  ;;  %3693 = vrcp.f32 %v2348_v18 }
0x124c   :  { %v3688_v7 = vpop.eup %3687  ;;  %v2351_v9 = vadd.f32 1.0, %v3686_v27  ;;  %3695 = vrcp.f32 %v2349_v32 }
0x124d   :  { %v3690_v17 = vpop.eup %3689  ;;  %v2352_v16 = vadd.f32 1.0, %v3688_v7  ;;  %3697 = vrcp.f32 %v2350_v45  ;;  %v2395_v45 = vrot.slane %v4614_v39, 7  ;;  %v2396_v7 = vrot.slane %v4617_v37, 7 }
0x124e   :  { %v2354_v47 = vadd.f32 1.0, %v3690_v17  ;;  %3699 = vrcp.f32 %v2351_v9 }
0x124f   :  { %3701 = vrcp.f32 %v2352_v16 }
0x1250   :  { %3703 = vrcp.f32 %v2354_v47  ;;  %v2397_v47 = vrot.slane %v4624_v58, 7 }
0x1251   :  { %3705 = vrcp.f32 %v2353_v35 }
0x1254   :  { %v4684_v2 = vpop.eup %3691 }
0x1255   :  { %v4686_v36 = vpop.eup %3693  ;;  %v2371_v12 = vmul.f32 2.0, %v4684_v2  ;;  %v2411_v9 = vmul.f32 %v4684_v2, %v2395_v45 }
0x1256   :  { %v4689_v29 = vpop.eup %3695  ;;  %v2372_v40 = vmul.f32 2.0, %v4686_v36  ;;  %v2412_v17 = vmul.f32 %v4686_v36, %v2396_v7 }
0x1257   :  { %v4692_v33 = vpop.eup %3697  ;;  %v3133_v43 = vadd.f32 -1.0, %v2371_v12  ;;  %v2373_v50 = vmul.f32 2.0, %v4689_v29  ;;  %v2413_v39 = vmul.f32 %v4689_v29, %v2397_v47 }
0x1258   :  { %v4695_v15 = vpop.eup %3699  ;;  %v3134_v30 = vadd.f32 -1.0, %v2372_v40  ;;  %v2374_v4 = vmul.f32 2.0, %v4692_v33  ;;  %v2398_v40 = vrot.slane %v4627_v6, 7 }
0x1259   :  { %v4698_v55 = vpop.eup %3701  ;;  %2427 = vrot.lane.b32.xlu0 %v3133_v43, %s3798_s3  ;;  %v3135_v56 = vadd.f32 -1.0, %v2373_v50  ;;  %v2375_v1 = vmul.f32 2.0, %v4695_v15 }
0x125a   :  { %2429 = vrot.lane.b32.xlu1 %v3134_v30, %s3798_s3  ;;  %v4703_v19 = vpop.eup %3703  ;;  %v3136_v11 = vadd.f32 -1.0, %v2374_v4  ;;  %v2376_v52 = vmul.f32 2.0, %v4698_v55  ;;  %v2414_v37 = vmul.f32 %v4692_v33, %v2398_v40  ;;  %v2399_v30 = vrot.slane %v4634_v62, 7 }
0x125b   :  { %v4706_v0 = vpop.eup %3705  ;;  %v3137_v46 = vadd.f32 -1.0, %v2375_v1  ;;  %v2378_v26 = vmul.f32 2.0, %v4703_v19 }
0x125c   :  { %v3138_v10 = vadd.f32 -1.0, %v2376_v52  ;;  %v2377_v48 = vmul.f32 2.0, %v4706_v0  ;;  %v2415_v6 = vmul.f32 %v4695_v15, %v2399_v30 }
0x125d   :  { %2431 = vrot.lane.b32.xlu0 %v3135_v56, %s3798_s3  ;;  %v3140_v59 = vadd.f32 -1.0, %v2378_v26  ;;  %v2400_v56 = vrot.slane %v4643_v63, 7 }
0x125e   :  { %2433 = vrot.lane.b32.xlu1 %v3136_v11, %s3798_s3  ;;  %v3139_v31 = vadd.f32 -1.0, %v2377_v48 }
0x125f   :  { %v2416_v11 = vmul.f32 %v4698_v55, %v2400_v56 }
0x1261   :  { %2435 = vrot.lane.b32.xlu0 %v3137_v46, %s3798_s3  ;;  %v2402_v46 = vrot.slane %v4645_v44, 7 }
0x1262   :  { %2437 = vrot.lane.b32.xlu1 %v3138_v10, %s3798_s3  ;;  %v2401_v10 = vrot.slane %v4637_v54, 7 }
0x1263   :  { %v2418_v63 = vmul.f32 %v4703_v19, %v2402_v46 }
0x1265   :  { %2441 = vrot.lane.b32.xlu0 %v3140_v59, %s3798_s3  ;;  %v2417_v59 = vmul.f32 %v4706_v0, %v2401_v10 }
0x1266   :  { %2439 = vrot.lane.b32.xlu1 %v3139_v31, %s3798_s3 }
0x12cb   :  { %v2428_v57 = vpop.permute.xlu0 %2427 }
0x12cc   :  { %v2430_v34 = vpop.permute.xlu1 %2429  ;;  %v2451_v28 = vmul.f32 %v4684_v2, %v2428_v57 }
0x12cd   :  { %v2452_v60 = vmul.f32 %v4686_v36, %v2430_v34 }
0x12ce   :  { %2467 = vrot.lane.b32.xlu0 %v2451_v28, %s3798_s3 }
0x12cf   :  { %2469 = vrot.lane.b32.xlu1 %v2452_v60, %s3798_s3  ;;  %v2432_v51 = vpop.permute.xlu0 %2431 }
0x12d0   :  { %v2434_v61 = vpop.permute.xlu1 %2433  ;;  %v2453_v13 = vmul.f32 %v4689_v29, %v2432_v51 }
0x12d1   :  { %v2454_v20 = vmul.f32 %v4692_v33, %v2434_v61 }
0x12d2   :  { %2471 = vrot.lane.b32.xlu0 %v2453_v13, %s3798_s3 }
0x12d3   :  { %2473 = vrot.lane.b32.xlu1 %v2454_v20, %s3798_s3  ;;  %v2436_v14 = vpop.permute.xlu0 %2435 }
0x12d4   :  { %v2438_v42 = vpop.permute.xlu1 %2437  ;;  %v2455_v3 = vmul.f32 %v4695_v15, %v2436_v14 }
0x12d5   :  { %v2456_v21 = vmul.f32 %v4698_v55, %v2438_v42 }
0x12d6   :  { %2475 = vrot.lane.b32.xlu0 %v2455_v3, %s3798_s3 }
0x12d7   :  { %2477 = vrot.lane.b32.xlu1 %v2456_v21, %s3798_s3  ;;  %v2442_v18 = vpop.permute.xlu0 %2441 }
0x12d8   :  { %v2440_v8 = vpop.permute.xlu1 %2439  ;;  %v2458_v32 = vmul.f32 %v4703_v19, %v2442_v18 }
0x12d9   :  { %v2457_v27 = vmul.f32 %v4706_v0, %v2440_v8 }
0x12da   :  { %2481 = vrot.lane.b32.xlu0 %v2458_v32, %s3798_s3 }
0x12db   :  { %2479 = vrot.lane.b32.xlu1 %v2457_v27, %s3798_s3 }
0x1340   :  { %v2468_v16 = vpop.permute.xlu0 %2467 }
0x1341   :  { %v2470_v35 = vpop.permute.xlu1 %2469  ;;  %v4737_v12 = vadd.f32 %v2468_v16, %v2411_v9 }
0x1342   :  { %v4740_v43 = vadd.f32 %v2470_v35, %v2412_v17 }
0x1343   :  { %3707 = vtanh.f32 %v4737_v12 }
0x1344   :  { %3709 = vtanh.f32 %v4740_v43  ;;  %v2472_v50 = vpop.permute.xlu0 %2471 }
0x1345   :  { %v2474_v4 = vpop.permute.xlu1 %2473  ;;  %v4747_v58 = vadd.f32 %v2472_v50, %v2413_v39 }
0x1346   :  { %v4750_v1 = vadd.f32 %v2474_v4, %v2414_v37 }
0x1347   :  { %3711 = vtanh.f32 %v4747_v58 }
0x1348   :  { %3713 = vtanh.f32 %v4750_v1  ;;  %v2476_v52 = vpop.permute.xlu0 %2475 }
0x1349   :  { %v2478_v26 = vpop.permute.xlu1 %2477  ;;  %v4757_v62 = vadd.f32 %v2476_v52, %v2415_v6 }
0x134a   :  { %v4760_v48 = vadd.f32 %v2478_v26, %v2416_v11 }
0x134b   :  { %3715 = vtanh.f32 %v4757_v62 }
0x134c   :  { %3717 = vtanh.f32 %v4760_v48  ;;  %v2482_v31 = vpop.permute.xlu0 %2481 }
0x134d   :  { %v3708_v57 = vpop.eup %3707  ;;  %v2480_v34 = vpop.permute.xlu1 %2479  ;;  %v4766_v28 = vadd.f32 %v2482_v31, %v2418_v63 }
0x134e   :  { %v3710_v44 = vpop.eup %3709  ;;  %v4768_v60 = vadd.f32 %v2480_v34, %v2417_v59  ;;  %2515 = vrot.lane.b32.xlu0 %v3708_v57, %s3798_s3 }
0x134f   :  { %3719 = vtanh.f32 %v4766_v28  ;;  %2517 = vrot.lane.b32.xlu1 %v3710_v44, %s3798_s3 }
0x1350   :  { %3721 = vtanh.f32 %v4768_v60 }
0x1351   :  { %v3712_v54 = vpop.eup %3711 }
0x1352   :  { %v3714_v51 = vpop.eup %3713  ;;  %2519 = vrot.lane.b32.xlu0 %v3712_v54, %s3798_s3 }
0x1353   :  { %2521 = vrot.lane.b32.xlu1 %v3714_v51, %s3798_s3 }
0x1355   :  { %v3716_v61 = vpop.eup %3715 }
0x1356   :  { %v3718_v13 = vpop.eup %3717  ;;  %2523 = vrot.lane.b32.xlu0 %v3716_v61, %s3798_s3 }
0x1357   :  { %2525 = vrot.lane.b32.xlu1 %v3718_v13, %s3798_s3 }
0x1359   :  { %v3720_v20 = vpop.eup %3719 }
0x135a   :  { %v3722_v14 = vpop.eup %3721  ;;  %2529 = vrot.lane.b32.xlu0 %v3720_v20, %s3798_s3 }
0x135b   :  { %2527 = vrot.lane.b32.xlu1 %v3722_v14, %s3798_s3 }
0x13c0   :  { %v2516_v42 = vpop.permute.xlu0 %2515 }
0x13c1   :  { %v2518_v3 = vpop.permute.xlu1 %2517  ;;  %v2539_v21 = vmul.f32 %v4684_v2, %v2516_v42 }
0x13c2   :  { %v2540_v18 = vmul.f32 %v4686_v36, %v2518_v3 }
0x13c3   :  { %v2555_v32 = vrot.slane %v2539_v21, 6 }
0x13c4   :  { %v2556_v8 = vrot.slane %v2540_v18, 5  ;;  %v2520_v27 = vpop.permute.xlu0 %2519 }
0x13c5   :  { %v2522_v45 = vpop.permute.xlu1 %2521  ;;  %v2541_v7 = vmul.f32 %v4689_v29, %v2520_v27 }
0x13c6   :  { %v2542_v9 = vmul.f32 %v4692_v33, %v2522_v45  ;;  %v2557_v16 = vsel %vm485_vm3, %v2556_v8, %v2555_v32 }
0x13c7   :  { %v2558_v17 = vrot.slane %v2541_v7, 4 }
0x13c8   :  { %v2560_v47 = vrot.slane %v2542_v9, 3  ;;  %v2524_v35 = vpop.permute.xlu0 %2523 }
0x13c9   :  { %v2559_v40 = vsel %vm488_vm4, %v2558_v17, %v2557_v16  ;;  %v2526_v39 = vpop.permute.xlu1 %2525  ;;  %v2543_v2 = vmul.f32 %v4695_v15, %v2524_v35 }
0x13ca   :  { %v2544_v36 = vmul.f32 %v4698_v55, %v2526_v39  ;;  %v2561_v30 = vsel %vm491_vm5, %v2560_v47, %v2559_v40 }
0x13cb   :  { %v2562_v37 = vrot.slane %v2543_v2, 2 }
0x13cc   :  { %v2564_v50 = vrot.slane %v2544_v36, 1  ;;  %v2530_v4 = vpop.permute.xlu0 %2529 }
0x13cd   :  { %v2563_v29 = vsel %vm494_vm6, %v2562_v37, %v2561_v30  ;;  %v2528_v33 = vpop.permute.xlu1 %2527  ;;  %v2546_v56 = vmul.f32 %v4703_v19, %v2530_v4 }
0x13ce   :  { %v2545_v6 = vmul.f32 %v4706_v0, %v2528_v33  ;;  %v2565_v11 = vsel %vm497_vm7, %v2564_v50, %v2563_v29 }
0x13cf   :  { %v2567_v52 = vrot.slane %v2546_v56, 7 }
0x13d0   :  { %v2566_v46 = vsel %vm500_vm8, %v2545_v6, %v2565_v11 }
0x13d1   :  { %v2568_v15 = vsel %vm503_vm9, %v2567_v52, %v2566_v46 }
0x13d2   :  { %2569 = vrot.lane.b32.xlu0 %v2568_v15, %s3799_s22 }
0x1444   :  { %v2570_v55 = vpop.permute.xlu0 %2569 }
0x1445   :  { %3314 = vmatmul.mubr.msk.f32.vlgmr.msra.gmra.mrb[8].mxu1 %vm178_vm10, %v2570_v55 }
0x1518   :  { %v2639_v26 = vpop.f32.mrb[8].mxu1 }
0x1519   :  { %v2644_v10 = vrot.slane %v2639_v26, 1  ;;  %v2645_v63 = vrot.slane %v2639_v26, 2  ;;  %v2646_v59 = vrot.slane %v2639_v26, 3  ;;  %v2647_v31 = vrot.slane %v2639_v26, 4  ;;  %v3315_v19 = vpop.f32.mrb[9].mxu1 }
0x151a   :  { %v2648_v57 = vrot.slane %v2639_v26, 5  ;;  %v2649_v0 = vrot.slane %v2639_v26, 6  ;;  %v2650_v34 = vrot.slane %v2639_v26, 7  ;;  %v2666_v44 = vadd.f32 %v2639_v26, %v3929_v49 }
0x151b   :  { %v2659_v54 = vadd.f32 %v2644_v10, %v3911_v22  ;;  %v2660_v51 = vadd.f32 %v2645_v63, %v3913_v23  ;;  %v2661_v61 = vadd.f32 %v2646_v59, %v3917_v25  ;;  %v2662_v13 = vadd.f32 %v2647_v31, %v3915_v24 }
0x151c   :  { %v2663_v20 = vadd.f32 %v2648_v57, %v3925_v41  ;;  %v2664_v14 = vadd.f32 %v2649_v0, %v3923_v38  ;;  %v3149_v42 = vmul.f32 -1.442695, %v2666_v44  ;;  %v2665_v3 = vadd.f32 %v2650_v34, %v3931_v53 }
0x151d   :  { %v3142_v21 = vmul.f32 -1.442695, %v2659_v54  ;;  %v3143_v18 = vmul.f32 -1.442695, %v2660_v51  ;;  %v3144_v8 = vmul.f32 -1.442695, %v2661_v61 }
0x151e   :  { %v3145_v32 = vmul.f32 -1.442695, %v2662_v13  ;;  %3723 = vpow2.f32 %v3149_v42  ;;  %v3146_v22 = vmul.f32 -1.442695, %v2663_v20  ;;  %v3147_v23 = vmul.f32 -1.442695, %v2664_v14 }
0x151f   :  { %3725 = vpow2.f32 %v3142_v21  ;;  %v3148_v25 = vmul.f32 -1.442695, %v2665_v3 }
0x1520   :  { %3727 = vpow2.f32 %v3143_v18 }
0x1521   :  { %3729 = vpow2.f32 %v3144_v8 }
0x1522   :  { %3731 = vpow2.f32 %v3145_v32 }
0x1523   :  { %3733 = vpow2.f32 %v3146_v22 }
0x1524   :  { %3735 = vpow2.f32 %v3147_v23 }
0x1525   :  { %3737 = vpow2.f32 %v3148_v25 }
0x1528   :  { %v3724_v24 = vpop.eup %3723 }
0x1529   :  { %v3726_v38 = vpop.eup %3725  ;;  %v2698_v2 = vadd.f32 1.0, %v3724_v24 }
0x152a   :  { %v3728_v41 = vpop.eup %3727  ;;  %v2691_v49 = vadd.f32 1.0, %v3726_v38  ;;  %v2739_v38 = vrot.slane %v4737_v12, 7 }
0x152b   :  { %v3730_v53 = vpop.eup %3729  ;;  %v2692_v27 = vadd.f32 1.0, %v3728_v41  ;;  %v2740_v41 = vrot.slane %v4740_v43, 7  ;;  %v2743_v43 = vrot.slane %v4757_v62, 7 }
0x152c   :  { %v3732_v45 = vpop.eup %3731  ;;  %v2693_v7 = vadd.f32 1.0, %v3730_v53  ;;  %3739 = vrcp.f32 %v2691_v49 }
0x152d   :  { %v3734_v9 = vpop.eup %3733  ;;  %v2694_v17 = vadd.f32 1.0, %v3732_v45  ;;  %3741 = vrcp.f32 %v2692_v27  ;;  %v2741_v45 = vrot.slane %v4747_v58, 7 }
0x152e   :  { %v3736_v16 = vpop.eup %3735  ;;  %v2695_v47 = vadd.f32 1.0, %v3734_v9  ;;  %3743 = vrcp.f32 %v2693_v7 }
0x152f   :  { %v3738_v35 = vpop.eup %3737  ;;  %v2696_v40 = vadd.f32 1.0, %v3736_v16  ;;  %3745 = vrcp.f32 %v2694_v17  ;;  %v2742_v17 = vrot.slane %v4750_v1, 7 }
0x1530   :  { %v2697_v39 = vadd.f32 1.0, %v3738_v35  ;;  %3747 = vrcp.f32 %v2695_v47 }
0x1531   :  { %3749 = vrcp.f32 %v2696_v40 }
0x1532   :  { %3751 = vrcp.f32 %v2697_v39 }
0x1533   :  { %3753 = vrcp.f32 %v2698_v2  ;;  %v2744_v2 = vrot.slane %v4760_v48, 7 }
0x1536   :  { %v4805_v36 = vpop.eup %3739 }
0x1537   :  { %v4807_v37 = vpop.eup %3741  ;;  %v2715_v50 = vmul.f32 2.0, %v4805_v36  ;;  %v2755_v49 = vmul.f32 %v4805_v36, %v2739_v38 }
0x1538   :  { %v4810_v30 = vpop.eup %3743  ;;  %v2716_v4 = vmul.f32 2.0, %v4807_v37  ;;  %v2756_v53 = vmul.f32 %v4807_v37, %v2740_v41 }
0x1539   :  { %v4813_v29 = vpop.eup %3745  ;;  %v3150_v33 = vadd.f32 -1.0, %v2715_v50  ;;  %v2717_v56 = vmul.f32 2.0, %v4810_v30  ;;  %v2757_v47 = vmul.f32 %v4810_v30, %v2741_v45 }
0x153a   :  { %v4816_v6 = vpop.eup %3747  ;;  %v3151_v11 = vadd.f32 -1.0, %v2716_v4  ;;  %v2718_v52 = vmul.f32 2.0, %v4813_v29  ;;  %v2758_v12 = vmul.f32 %v4813_v29, %v2742_v17 }
0x153b   :  { %v4819_v46 = vpop.eup %3749  ;;  %2771 = vrot.lane.b32.xlu1 %v3150_v33, %s3798_s3  ;;  %v3152_v15 = vadd.f32 -1.0, %v2717_v56  ;;  %v2719_v55 = vmul.f32 2.0, %v4816_v6  ;;  %v2759_v58 = vmul.f32 %v4816_v6, %v2743_v43  ;;  %v2745_v33 = vrot.slane %v4768_v60, 7 }
0x153c   :  { %2773 = vrot.lane.b32.xlu0 %v3151_v11, %s3798_s3  ;;  %v4824_v26 = vpop.eup %3751  ;;  %v3153_v10 = vadd.f32 -1.0, %v2718_v52  ;;  %v2720_v63 = vmul.f32 2.0, %v4819_v46  ;;  %v2760_v1 = vmul.f32 %v4819_v46, %v2744_v2  ;;  %v2746_v52 = vrot.slane %v4766_v28, 7 }
0x153d   :  { %v4827_v59 = vpop.eup %3753  ;;  %v3154_v31 = vadd.f32 -1.0, %v2719_v55  ;;  %v2721_v19 = vmul.f32 2.0, %v4824_v26  ;;  %v2761_v62 = vmul.f32 %v4824_v26, %v2745_v33 }
0x153e   :  { %v3155_v57 = vadd.f32 -1.0, %v2720_v63  ;;  %v2722_v0 = vmul.f32 2.0, %v4827_v59  ;;  %v2762_v48 = vmul.f32 %v4827_v59, %v2746_v52 }
0x153f   :  { %2775 = vrot.lane.b32.xlu1 %v3152_v15, %s3798_s3  ;;  %v3156_v34 = vadd.f32 -1.0, %v2721_v19 }
0x1540   :  { %2777 = vrot.lane.b32.xlu0 %v3153_v10, %s3798_s3  ;;  %v3157_v44 = vadd.f32 -1.0, %v2722_v0  ;;  %v2891_v0 = vld [vmem:[%s4926_s4] sm:$0xff] }
0x1543   :  { %2779 = vrot.lane.b32.xlu1 %v3154_v31, %s3798_s3 }
0x1544   :  { %2781 = vrot.lane.b32.xlu0 %v3155_v57, %s3798_s3 }
0x1547   :  { %2783 = vrot.lane.b32.xlu1 %v3156_v34, %s3798_s3  ;;  %v2892_v34 = vld [vmem:[%s4926_s4 + $0x8] sm:$0xff] }
0x1548   :  { %2785 = vrot.lane.b32.xlu0 %v3157_v44, %s3798_s3  ;;  %v2893_v44 = vld [vmem:[%s4926_s4 + $0x10] sm:$0xff] }
0x15ad   :  { %v2772_v54 = vpop.permute.xlu1 %2771 }
0x15ae   :  { %v2774_v51 = vpop.permute.xlu0 %2773  ;;  %v2795_v61 = vmul.f32 %v4805_v36, %v2772_v54  ;;  %v3376_v54 = vpack.c.bf16 %v2892_v34, %v2891_v0 }
0x15af   :  { %v2796_v13 = vmul.f32 %v4807_v37, %v2774_v51  ;;  %v2894_v51 = vld [vmem:[%s4926_s4 + $0x18] sm:$0xff] }
0x15b0   :  { %2811 = vrot.lane.b32.xlu1 %v2795_v61, %s3798_s3  ;;  %3377 = vmatpush3.bf16.msra.mxu0 %v3376_v54 }
0x15b1   :  { %2813 = vrot.lane.b32.xlu0 %v2796_v13, %s3798_s3  ;;  %v2776_v20 = vpop.permute.xlu1 %2775  ;;  %3378 = vmatprep.subr.bf16.mxu0 %v3795_v5 }
0x15b2   :  { %v2778_v14 = vpop.permute.xlu0 %2777  ;;  %v2797_v42 = vmul.f32 %v4810_v30, %v2776_v20  ;;  %v3379_v20 = vpack.c.bf16 %v2894_v51, %v2893_v44 }
0x15b3   :  { %v2798_v3 = vmul.f32 %v4813_v29, %v2778_v14 }
0x15b4   :  { %2815 = vrot.lane.b32.xlu1 %v2797_v42, %s3798_s3  ;;  %3380 = vmatpush3.bf16.msra.mxu0 %v3379_v20 }
0x15b5   :  { %2817 = vrot.lane.b32.xlu0 %v2798_v3, %s3798_s3  ;;  %v2780_v21 = vpop.permute.xlu1 %2779 }
0x15b6   :  { %v2782_v18 = vpop.permute.xlu0 %2781  ;;  %v2799_v8 = vmul.f32 %v4816_v6, %v2780_v21 }
0x15b7   :  { %v2800_v32 = vmul.f32 %v4819_v46, %v2782_v18 }
0x15b8   :  { %2819 = vrot.lane.b32.xlu1 %v2799_v8, %s3798_s3 }
0x15b9   :  { %2821 = vrot.lane.b32.xlu0 %v2800_v32, %s3798_s3  ;;  %v2784_v22 = vpop.permute.xlu1 %2783 }
0x15ba   :  { %v2786_v23 = vpop.permute.xlu0 %2785  ;;  %v2801_v25 = vmul.f32 %v4824_v26, %v2784_v22 }
0x15bb   :  { %v2802_v24 = vmul.f32 %v4827_v59, %v2786_v23 }
0x15bc   :  { %2823 = vrot.lane.b32.xlu1 %v2801_v25, %s3798_s3 }
0x15bd   :  { %2825 = vrot.lane.b32.xlu0 %v2802_v24, %s3798_s3 }
0x1622   :  { %v2812_v27 = vpop.permute.xlu1 %2811 }
0x1623   :  { %v2814_v7 = vpop.permute.xlu0 %2813  ;;  %v2835_v9 = vadd.f32 %v2812_v27, %v2755_v49 }
0x1624   :  { %v2836_v16 = vadd.f32 %v2814_v7, %v2756_v53 }
0x1625   :  { %3755 = vtanh.f32 %v2835_v9 }
0x1626   :  { %3757 = vtanh.f32 %v2836_v16  ;;  %v2816_v35 = vpop.permute.xlu1 %2815 }
0x1627   :  { %v2818_v40 = vpop.permute.xlu0 %2817  ;;  %v2837_v39 = vadd.f32 %v2816_v35, %v2757_v47 }
0x1628   :  { %v2838_v50 = vadd.f32 %v2818_v40, %v2758_v12 }
0x1629   :  { %3759 = vtanh.f32 %v2837_v39  ;;  %v3158_v39 = vld [vmem:[%s4927_s5] ss:$0 sm:$0xff] }
0x162a   :  { %3761 = vtanh.f32 %v2838_v50  ;;  %v2820_v4 = vpop.permute.xlu1 %2819 }
0x162b   :  { %v2822_v56 = vpop.permute.xlu0 %2821  ;;  %v2839_v11 = vadd.f32 %v2820_v4, %v2759_v58 }
0x162c   :  { %v2840_v15 = vadd.f32 %v2822_v56, %v2760_v1 }
0x162d   :  { %3763 = vtanh.f32 %v2839_v11 }
0x162e   :  { %3765 = vtanh.f32 %v2840_v15  ;;  %v2824_v55 = vpop.permute.xlu1 %2823 }
0x162f   :  { %v3756_v10 = vpop.eup %3755  ;;  %v2826_v63 = vpop.permute.xlu0 %2825  ;;  %v2841_v31 = vadd.f32 %v2824_v55, %v2761_v62 }
0x1630   :  { %v3758_v19 = vpop.eup %3757  ;;  %v2842_v57 = vadd.f32 %v2826_v63, %v2762_v48  ;;  %2859 = vrot.lane.b32.xlu1 %v3756_v10, %s3798_s3 }
0x1631   :  { %3767 = vtanh.f32 %v2841_v31  ;;  %2861 = vrot.lane.b32.xlu0 %v3758_v19, %s3798_s3 }
0x1632   :  { %3769 = vtanh.f32 %v2842_v57 }
0x1633   :  { %v3760_v28 = vpop.eup %3759 }
0x1634   :  { %v3762_v60 = vpop.eup %3761  ;;  %2863 = vrot.lane.b32.xlu1 %v3760_v28, %s3798_s3 }
0x1635   :  { %2865 = vrot.lane.b32.xlu0 %v3762_v60, %s3798_s3 }
0x1637   :  { %v3764_v61 = vpop.eup %3763 }
0x1638   :  { %v3766_v13 = vpop.eup %3765  ;;  %2867 = vrot.lane.b32.xlu1 %v3764_v61, %s3798_s3 }
0x1639   :  { %2869 = vrot.lane.b32.xlu0 %v3766_v13, %s3798_s3 }
0x163b   :  { %v3768_v14 = vpop.eup %3767 }
0x163c   :  { %v3770_v42 = vpop.eup %3769  ;;  %2871 = vrot.lane.b32.xlu1 %v3768_v14, %s3798_s3 }
0x163d   :  { %2873 = vrot.lane.b32.xlu0 %v3770_v42, %s3798_s3 }
0x16a2   :  { %v2860_v3 = vpop.permute.xlu1 %2859 }
0x16a3   :  { %v2862_v21 = vpop.permute.xlu0 %2861  ;;  %v2883_v18 = vmul.f32 %v4805_v36, %v2860_v3 }
0x16a4   :  { %v2884_v8 = vmul.f32 %v4807_v37, %v2862_v21 }
0x16a5   :  { %v2910_v22 = vrot.slane %v2883_v18, 7 }
0x16a6   :  { %v2911_v32 = vrot.slane %v2884_v8, 6  ;;  %v2864_v23 = vpop.permute.xlu1 %2863 }
0x16a7   :  { %v2866_v25 = vpop.permute.xlu0 %2865  ;;  %v2885_v24 = vmul.f32 %v4810_v30, %v2864_v23 }
0x16a8   :  { %v2886_v5 = vmul.f32 %v4813_v29, %v2866_v25  ;;  %v2912_v41 = vsel %vm485_vm3, %v2911_v32, %v2910_v22 }
0x16a9   :  { %v2913_v38 = vrot.slane %v2885_v24, 5 }
0x16aa   :  { %v2915_v49 = vrot.slane %v2886_v5, 4  ;;  %v2868_v53 = vpop.permute.xlu1 %2867 }
0x16ab   :  { %v2914_v27 = vsel %vm488_vm4, %v2913_v38, %v2912_v41  ;;  %v2870_v45 = vpop.permute.xlu0 %2869  ;;  %v2887_v36 = vmul.f32 %v4816_v6, %v2868_v53 }
0x16ac   :  { %v2888_v37 = vmul.f32 %v4819_v46, %v2870_v45  ;;  %v2916_v17 = vsel %vm491_vm5, %v2915_v49, %v2914_v27 }
0x16ad   :  { %v2917_v7 = vrot.slane %v2887_v36, 3 }
0x16ae   :  { %v2919_v9 = vrot.slane %v2888_v37, 2  ;;  %v2872_v16 = vpop.permute.xlu1 %2871 }
0x16af   :  { %v2918_v30 = vsel %vm494_vm6, %v2917_v7, %v2916_v17  ;;  %v2874_v29 = vpop.permute.xlu0 %2873  ;;  %v2889_v47 = vmul.f32 %v4824_v26, %v2872_v16 }
0x16b0   :  { %v2890_v35 = vmul.f32 %v4827_v59, %v2874_v29  ;;  %v2920_v43 = vsel %vm497_vm7, %v2919_v9, %v2918_v30 }
0x16b1   :  { %v2921_v12 = vrot.slane %v2889_v47, 1 }
0x16b3   :  { %v2922_v40 = vsel %vm500_vm8, %v2921_v12, %v2920_v43 }
0x16b4   :  { %v2923_v6 = vsel %vm503_vm9, %v2890_v35, %v2922_v40 }
0x16b5   :  { %2924 = vrot.lane.b32.xlu1 %v2923_v6, %s3799_s22 }
0x1727   :  { %v2925_v46 = vpop.permute.xlu1 %2924 }
0x1728   :  { %3325 = vmatmul.mubr.msk.f32.vlgmr.msra.gmra.mrb[14].mxu0 %vm178_vm10, %v2925_v46 }
0x17fb   :  { %v2994_v26 = vpop.f32.mrb[14].mxu0 }
0x17fc   :  { %v2995_v2 = vadd.f32 %v3158_v39, %v2994_v26  ;;  %v3326_v59 = vpop.f32.mrb[15].mxu0 }
0x17fe   :  { %2998 = vst [vmem:[#allocation2] sm:$0xff] %v2995_v2 }
0x17ff   :  { %3782 = shalt.err (!%p3779_p4)
}
0x1800   :  { %s3783_s12 = scalar_lea.hbm %s4928_s6, 128 }
0x1801   :  { %p3784_p5 = scmp.ne.s32.totalorder %s4928_s6, %s3783_s12  ;;  %p3787_p6 = scmp.lt.u32.totalorder %s3783_s12, %s4928_s6 }
0x1803   :  { %p3789_p7 = pnand %p3787_p6, %p3784_p5 }
0x1805   :  { %3792 = shalt.err (!%p3789_p7)
}
0x1806   :  { %3008 = dma.vmem_to_hbm [thread:$0]  %s3006_s8, 128, %s4928_s6, [#allocation3]  }
0x1807   :  { %3793 = dma.done.wait [#allocation3], 128  }
0x1808   :  { %3794 = vsyncadd [#allocation3], 4294967168 }
0x1809   :  { %3012 = vsyncpa [#allocation3], 1 }

</bundles_post_ra>
